<compile_context>
chip_gen: v7x
topology: tpu7x:2x2x1
jax: 0.10.0
libtpu: 0.0.40
codegen_flags: <defaults>
</compile_context>

<pallas_src>
import jax
import jax.numpy as jnp
from jax.experimental import pallas as pl
from jax.experimental.pallas import tpu as pltpu


# ----------------------------------------------------------------------------
# Pallas kernel: forward pass for one block of Bb batch rows
# ----------------------------------------------------------------------------
def gerador_kernel(emb_ref,        # (T*Bb, 2E)  rows time-major: [emb(t)|emb(T-1-t)]
                   w_ih_ref,       # (2E, 8H)    stacked+fused input projection
                   b_ih_ref,       # (1, 8H)     folded biases (fused gate order)
                   w_hh_ref,       # (2H, 8H)    block-diag fused recurrent weights
                   w_att_ref,      # (2H, 2H)
                   b_att_ref,      # (1, 2H)
                   w_comb_ref,     # (4H, 2H)
                   b_comb_ref,     # (1, 2H)
                   w_out_ref,      # (2H, P)     zero-padded to P lanes
                   b_out_ref,      # (1, P)      pad lanes = -1e30
                   out_ref,        # (T*Bb, P)
                   state_ref,      # (Bb, 4H)    [h_f | h_b | c_f | c_b]
                   gx_scratch,     # VMEM (T*Bb, 8H)
                   seq_scratch):   # VMEM (T*Bb, 2H)
    TB = emb_ref.shape[0]
    Bb = state_ref.shape[0]
    T = TB // Bb
    H = w_hh_ref.shape[0] // 2
    f32 = jnp.float32

    # ---- hoisted input projection: one (T*Bb,2E)x(2E,8H) matmul -> VMEM ----
    # Row block t of the result holds fwd gate inputs for time t and bwd gate
    # inputs for time T-1-t (the wrapper stacked emb / reversed-emb columns).
    gx_scratch[...] = (jnp.dot(emb_ref[...], w_ih_ref[...],
                               preferred_element_type=f32) + b_ih_ref[...])

    w_hh = w_hh_ref[...]                              # (2H, 8H)

    hc = jnp.zeros((Bb, 2 * H), f32)                  # [h_f | h_b]
    cc = jnp.zeros((Bb, 2 * H), f32)                  # [c_f | c_b]

    # Both directions advance in the same unrolled loop (independent chains
    # overlap on the MXU): fwd consumes time t, bwd consumes time T-1-t.
    # Gate columns: [i_f, i_b, f_f, f_b, o_f, o_b, g_f, g_b], each width H.
    for t in range(T):
        g = (gx_scratch[t * Bb:(t + 1) * Bb, :]
             + jnp.dot(hc, w_hh, preferred_element_type=f32))      # (Bb, 8H)
        sig = jax.nn.sigmoid(g[:, 0:6 * H])           # one EUP pass, (Bb, 6H)
        gg = jnp.tanh(g[:, 6 * H:8 * H])              # one EUP pass, (Bb, 2H)
        i_g = sig[:, 0:2 * H]
        f_g = sig[:, 2 * H:4 * H]
        o_g = sig[:, 4 * H:6 * H]
        cc = f_g * cc + i_g * gg
        hc = o_g * jnp.tanh(cc)
        # sequence outputs: fwd h belongs to time t, bwd h to time T-1-t
        seq_scratch[t * Bb:(t + 1) * Bb, 0:H] = hc[:, 0:H]
        seq_scratch[(T - 1 - t) * Bb:(T - t) * Bb, H:2 * H] = hc[:, H:2 * H]

    # final LSTM state: single lane-dense (Bb, 4H) store
    state_ref[...] = jnp.concatenate([hc, cc], axis=1)

    out_seq = seq_scratch[...]                        # (T*Bb, 2H)

    # ---- attention (softmax over the 2H features), context over time -------
    att = (jnp.dot(out_seq, w_att_ref[...], preferred_element_type=f32)
           + b_att_ref[...])
    att = jnp.exp(att - jnp.max(att, axis=-1, keepdims=True))
    att = att * pl.reciprocal(jnp.sum(att, axis=-1, keepdims=True), approx=True)
    weighted = att * out_seq                          # (T*Bb, 2H)
    ctx = jnp.sum(weighted.reshape(T, Bb, 2 * H), axis=0)           # (Bb, 2H)

    # combined = concat([ctx_rep, out_seq], -1) @ w_comb + b_comb, split into
    # one tiny (Bb, 2H) matmul on the context (broadcast-added over time) and
    # the full matmul on out_seq.
    w_comb = w_comb_ref[...]
    ctx_proj = (jnp.dot(ctx, w_comb[0:2 * H, :], preferred_element_type=f32)
                + b_comb_ref[...])                    # (Bb, 2H)
    out_proj = jnp.dot(out_seq, w_comb[2 * H:4 * H, :],
                       preferred_element_type=f32)    # (T*Bb, 2H)
    combined = (out_proj.reshape(T, Bb, 2 * H)
                + ctx_proj[None, :, :]).reshape(TB, 2 * H)

    # ---- output projection + softmax (lane-dense; pad cols killed by bias) --
    logits = (jnp.dot(combined, w_out_ref[...], preferred_element_type=f32)
              + b_out_ref[...])                       # (T*Bb, P)
    e = jnp.exp(logits - jnp.max(logits, axis=-1, keepdims=True))
    out_ref[...] = e * pl.reciprocal(jnp.sum(e, axis=-1, keepdims=True),
                                     approx=True)     # one contiguous slab store


# ----------------------------------------------------------------------------
# Wrapper
# ----------------------------------------------------------------------------
def _round_up(x, m):
    return ((x + m - 1) // m) * m


def _choose_b_blk(B):
    """Batch rows per grid step: 8..128, >=2 blocks when the batch is large."""
    b8 = _round_up(B, 8)
    if b8 <= 16:
        return b8
    return min(128, _round_up((b8 + 1) // 2, 8))


def _fuse_gate_cols(mat_f, mat_b):
    """Pack per-direction [i,f,g,o] columns into [i_f,i_b,f_f,f_b,o_f,o_b,g_f,g_b]."""
    H = mat_f.shape[-1] // 4
    i_f, f_f, g_f, o_f = (mat_f[..., k * H:(k + 1) * H] for k in range(4))
    i_b, f_b, g_b, o_b = (mat_b[..., k * H:(k + 1) * H] for k in range(4))
    return jnp.concatenate([i_f, i_b, f_f, f_b, o_f, o_b, g_f, g_b], axis=-1)


@jax.jit
def gerador_pallas(tokens, params):
    emb = params["emb_w"][tokens].astype(jnp.float32)     # (B, T, E) glue gather
    B, T, E = emb.shape
    H = params["w_hh_f"].shape[0]
    OUT = params["w_out"].shape[1]
    P = _round_up(OUT, 128)                               # lane-dense output
    B_BLK = _choose_b_blk(B)
    B_pad = _round_up(_round_up(B, 8), B_BLK)
    NB = B_pad // B_BLK
    TB = T * B_BLK

    # ---- weight packing (all plain-XLA, once per trace) --------------------
    # input projection: rows 0:E multiply emb(t), rows E:2E multiply emb(T-1-t)
    zE = jnp.zeros_like(params["w_ih_f"])                 # (E, 4H)
    w_ih = jnp.concatenate([_fuse_gate_cols(params["w_ih_f"], zE),
                            _fuse_gate_cols(zE, params["w_ih_b"])], axis=0)
    b_ih = _fuse_gate_cols(params["b_f"], params["b_b"])  # (1, 8H)
    # recurrent projection: block-diagonal over [h_f | h_b], fused gate columns
    zH = jnp.zeros_like(params["w_hh_f"])                 # (H, 4H)
    w_hh = jnp.concatenate([_fuse_gate_cols(params["w_hh_f"], zH),
                            _fuse_gate_cols(zH, params["w_hh_b"])], axis=0)

    # zero-pad output head to 128 lanes; pad bias = -1e30 so padded logits
    # contribute exp(.)=0 to the softmax (f32 path).
    w_out = jnp.pad(params["w_out"], ((0, 0), (0, P - OUT)))
    b_out = jnp.pad(params["b_out"], ((0, 0), (0, P - OUT)),
                    constant_values=-1e30)

    # ---- activations: contiguous (NB, T*B_BLK, 2E) blocks -------------------
    # row t*B_BLK + j of block nb  <->  batch nb*B_BLK + j, time t;
    # columns are [emb at time t | emb at time T-1-t] for the bwd direction.
    emb_p = jnp.pad(emb, ((0, B_pad - B), (0, 0), (0, 0)))
    emb_fwd = jnp.transpose(emb_p.reshape(NB, B_BLK, T, E), (0, 2, 1, 3))
    emb_in = jnp.concatenate([emb_fwd, emb_fwd[:, ::-1]], axis=-1)
    emb_in = emb_in.reshape(NB, TB, 2 * E)

    # TODO(synk): consider pipeline_mode=pl.Buffered(1) on the grid-invariant
    # weight BlockSpecs (and an explicit vmem_limit_bytes) if H/P are scaled
    # up enough to pressure v7x's 64 MiB VMEM; irrelevant at these sizes.
    grid_spec = pltpu.PrefetchScalarGridSpec(
        num_scalar_prefetch=0,
        grid=(NB,),
        in_specs=[
            pl.BlockSpec((None, TB, 2 * E), lambda b: (b, 0, 0)),   # emb block
            pl.BlockSpec((2 * E, 8 * H), lambda b: (0, 0)),         # w_ih
            pl.BlockSpec((1, 8 * H), lambda b: (0, 0)),             # b_ih
            pl.BlockSpec((2 * H, 8 * H), lambda b: (0, 0)),         # w_hh fused
            pl.BlockSpec((2 * H, 2 * H), lambda b: (0, 0)),         # w_att
            pl.BlockSpec((1, 2 * H), lambda b: (0, 0)),             # b_att
            pl.BlockSpec((4 * H, 2 * H), lambda b: (0, 0)),         # w_comb
            pl.BlockSpec((1, 2 * H), lambda b: (0, 0)),             # b_comb
            pl.BlockSpec((2 * H, P), lambda b: (0, 0)),             # w_out (pad)
            pl.BlockSpec((1, P), lambda b: (0, 0)),                 # b_out (pad)
        ],
        out_specs=[
            pl.BlockSpec((None, TB, P), lambda b: (b, 0, 0)),       # softmax out
            pl.BlockSpec((B_BLK, 4 * H), lambda b: (b, 0)),         # [hf|hb|cf|cb]
        ],
        scratch_shapes=[pltpu.VMEM((TB, 8 * H), jnp.float32),
                        pltpu.VMEM((TB, 2 * H), jnp.float32)],
    )

    out_pad, state = pl.pallas_call(
        gerador_kernel,
        out_shape=(jax.ShapeDtypeStruct((NB, TB, P), jnp.float32),
                   jax.ShapeDtypeStruct((B_pad, 4 * H), jnp.float32)),
        grid_spec=grid_spec,
        compiler_params=pltpu.CompilerParams(dimension_semantics=("parallel",)),
    )(emb_in, w_ih, b_ih, w_hh,
      params["w_att"], params["b_att"],
      params["w_comb"], params["b_comb"],
      w_out, b_out)

    # un-pack: row t*B_BLK + j of block nb -> (batch nb*B_BLK + j, time t)
    out = out_pad.reshape(NB, T, B_BLK, P).transpose(0, 2, 1, 3)
    out = out.reshape(B_pad, T, P)[:B, :, :OUT]                      # (B, T, OUT)
    hn = jnp.stack([state[:B, 0:H], state[:B, H:2 * H]], axis=0)     # (2, B, H)
    cn = jnp.stack([state[:B, 2 * H:3 * H], state[:B, 3 * H:4 * H]], axis=0)
    return out, (hn, cn)


# ----------------------------------------------------------------------------
# Pure-JAX reference (for validation)
# ----------------------------------------------------------------------------
def gerador_ref(tokens, params):
    emb = params["emb_w"][tokens].astype(jnp.float32)    # (B, T, E)
    B, T, E = emb.shape
    H = params["w_hh_f"].shape[0]

    def cell(x, h, c, w_ih, w_hh, b):
        gates = x @ w_ih + h @ w_hh + b
        i = jax.nn.sigmoid(gates[:, 0 * H:1 * H])
        f = jax.nn.sigmoid(gates[:, 1 * H:2 * H])
        g = jnp.tanh(gates[:, 2 * H:3 * H])
        o = jax.nn.sigmoid(gates[:, 3 * H:4 * H])
        c = f * c + i * g
        return jnp.tanh(c) * o, c

    h = jnp.zeros((B, H)); c = jnp.zeros((B, H)); fwd = []
    for t in range(T):
        h, c = cell(emb[:, t], h, c, params["w_ih_f"], params["w_hh_f"], params["b_f"])
        fwd.append(h)
    h_f, c_f = h, c

    h = jnp.zeros((B, H)); c = jnp.zeros((B, H)); bwd = [None] * T
    for t in range(T - 1, -1, -1):
        h, c = cell(emb[:, t], h, c, params["w_ih_b"], params["w_hh_b"], params["b_b"])
        bwd[t] = h
    h_b, c_b = h, c

    out_seq = jnp.concatenate([jnp.stack(fwd, 1), jnp.stack(bwd, 1)], axis=-1)
    att = jax.nn.softmax(out_seq @ params["w_att"] + params["b_att"], axis=-1)
    ctx = jnp.sum(att * out_seq, axis=1, keepdims=True)
    ctx = jnp.broadcast_to(ctx, out_seq.shape)
    comb = jnp.concatenate([ctx, out_seq], axis=-1) @ params["w_comb"] + params["b_comb"]
    out = jax.nn.softmax(comb @ params["w_out"] + params["b_out"], axis=-1)
    hn = jnp.stack([h_f, h_b], 0)
    cn = jnp.stack([c_f, c_b], 0)
    return out, (hn, cn)


# ----------------------------------------------------------------------------
# Deterministic parameter init + driver
# ----------------------------------------------------------------------------
def init_params(key, input_dim, embedding_dim, hidden_dim, output_size):
    H, E = hidden_dim, embedding_dim
    ks = jax.random.split(key, 12)
    s = 1.0 / jnp.sqrt(jnp.float32(H))
    u = lambda k, shape: jax.random.uniform(k, shape, jnp.float32, -s, s)
    return {
        "emb_w":  jax.random.normal(ks[0], (input_dim, E), jnp.float32),
        "w_ih_f": u(ks[1], (E, 4 * H)),
        "w_hh_f": u(ks[2], (H, 4 * H)),
        "b_f":    u(ks[3], (1, 4 * H)),          # b_ih + b_hh folded together
        "w_ih_b": u(ks[4], (E, 4 * H)),
        "w_hh_b": u(ks[5], (H, 4 * H)),
        "b_b":    u(ks[6], (1, 4 * H)),
        "w_att":  u(ks[7], (2 * H, 2 * H)),
        "b_att":  u(ks[8], (1, 2 * H)),
        "w_comb": u(ks[9], (4 * H, 2 * H)),
        "b_comb": u(ks[10], (1, 2 * H)),
        "w_out":  u(ks[11], (2 * H, output_size)),
        "b_out":  jnp.zeros((1, output_size), jnp.float32),
    }


if __name__ == "__main__":
    INPUT_DIM, EMB_DIM, HIDDEN_DIM, OUTPUT_SIZE = 20, 32, 32, 16
    B, T = 2, 8

    key = jax.random.PRNGKey(0)
    k_tok, k_par = jax.random.split(key)
    params = init_params(k_par, INPUT_DIM, EMB_DIM, HIDDEN_DIM, OUTPUT_SIZE)
    tokens = jax.random.randint(k_tok, (B, T), 0, INPUT_DIM, jnp.int32)

    out, (hn, cn) = gerador_pallas(tokens, params)
    jax.block_until_ready(out)
    jax.block_until_ready(hn)
    jax.block_until_ready(cn)

    ref_out, (ref_hn, ref_cn) = gerador_ref(tokens, params)
    # 2e-3 on the softmax outputs to accommodate pl.reciprocal(approx=True)
    # (used intentionally in both the attention and output softmax denominators)
    assert jnp.allclose(out, ref_out, atol=2e-3, rtol=2e-3)
    assert jnp.allclose(hn, ref_hn, atol=1e-3, rtol=1e-3)
    assert jnp.allclose(cn, ref_cn, atol=1e-3, rtol=1e-3)

    print("KERNEL_OK")

    # TODO(synk): initial hidden state (the optional `hidden` arg of the
    # PyTorch forward) is not plumbed through; zeros are used, matching the
    # default hidden=None path.
</pallas_src>

<mosaic_0001>
module attributes {stable_mosaic.version = 11 : i64} {
  func.func @gerador_kernel(%arg0: i32, %arg1: memref<1x64x64xf32, #tpu.memory_space<vmem>>, %arg2: memref<64x256xf32, #tpu.memory_space<vmem>>, %arg3: memref<1x256xf32, #tpu.memory_space<vmem>>, %arg4: memref<64x256xf32, #tpu.memory_space<vmem>>, %arg5: memref<64x64xf32, #tpu.memory_space<vmem>>, %arg6: memref<1x64xf32, #tpu.memory_space<vmem>>, %arg7: memref<128x64xf32, #tpu.memory_space<vmem>>, %arg8: memref<1x64xf32, #tpu.memory_space<vmem>>, %arg9: memref<64x128xf32, #tpu.memory_space<vmem>>, %arg10: memref<1x128xf32, #tpu.memory_space<vmem>>, %arg11: memref<1x64x128xf32, #tpu.memory_space<vmem>>, %arg12: memref<8x128xf32, #tpu.memory_space<vmem>>, %arg13: memref<64x256xf32, #tpu.memory_space<vmem>>, %arg14: memref<64x64xf32, #tpu.memory_space<vmem>>) attributes {dimension_semantics = [#tpu.dimension_semantics<parallel>], iteration_bounds = array<i64: 1>, scalar_prefetch = 0 : i64, scratch_operands = 2 : i64, tpu.core_type = #tpu.core_type<tc>, window_params = [{transform_indices = @transform_0, window_bounds = array<i64: 1, 64, 64>}, {pipeline_mode = #tpu.pipeline_mode<synchronous>, transform_indices = @transform_1, window_bounds = array<i64: 64, 256>}, {pipeline_mode = #tpu.pipeline_mode<synchronous>, transform_indices = @transform_2, window_bounds = array<i64: 1, 256>}, {pipeline_mode = #tpu.pipeline_mode<synchronous>, transform_indices = @transform_3, window_bounds = array<i64: 64, 256>}, {pipeline_mode = #tpu.pipeline_mode<synchronous>, transform_indices = @transform_4, window_bounds = array<i64: 64, 64>}, {pipeline_mode = #tpu.pipeline_mode<synchronous>, transform_indices = @transform_5, window_bounds = array<i64: 1, 64>}, {pipeline_mode = #tpu.pipeline_mode<synchronous>, transform_indices = @transform_6, window_bounds = array<i64: 128, 64>}, {pipeline_mode = #tpu.pipeline_mode<synchronous>, transform_indices = @transform_7, window_bounds = array<i64: 1, 64>}, {pipeline_mode = #tpu.pipeline_mode<synchronous>, transform_indices = @transform_8, window_bounds = array<i64: 64, 128>}, {pipeline_mode = #tpu.pipeline_mode<synchronous>, transform_indices = @transform_9, window_bounds = array<i64: 1, 128>}, {transform_indices = @transform_10, window_bounds = array<i64: 1, 64, 128>}, {transform_indices = @transform_11, window_bounds = array<i64: 8, 128>}]} {
    %c0 = arith.constant 0 : index
    %c0_0 = arith.constant 0 : index
    %c0_1 = arith.constant 0 : index
    %0 = vector.load %arg1[%c0, %c0_0, %c0_1] : memref<1x64x64xf32, #tpu.memory_space<vmem>>, vector<1x64x64xf32>
    %1 = vector.shape_cast %0 : vector<1x64x64xf32> to vector<64x64xf32>
    %c0_2 = arith.constant 0 : index
    %c0_3 = arith.constant 0 : index
    %2 = vector.load %arg2[%c0_2, %c0_3] : memref<64x256xf32, #tpu.memory_space<vmem>>, vector<64x256xf32>
    %cst = arith.constant dense<0.000000e+00> : vector<64x256xf32>
    %3 = tpu.matmul %1, %2, %cst {dimension_numbers = #tpu.dot_dimension_numbers<[1], [0], [0], [1], [0, 0, 1, 1], [], []>} : vector<64x64xf32>, vector<64x256xf32>, vector<64x256xf32> -> vector<64x256xf32>
    %c0_4 = arith.constant 0 : index
    %c0_5 = arith.constant 0 : index
    %4 = vector.load %arg3[%c0_4, %c0_5] : memref<1x256xf32, #tpu.memory_space<vmem>>, vector<1x256xf32>
    %5 = vector.broadcast %4 : vector<1x256xf32> to vector<64x256xf32>
    %6 = arith.addf %3, %5 : vector<64x256xf32>
    %c0_6 = arith.constant 0 : index
    %c0_7 = arith.constant 0 : index
    %7 = vector.load %arg13[%c0_6, %c0_7] : memref<64x256xf32, #tpu.memory_space<vmem>>, vector<64x256xf32>
    tpu.vector_store %arg13[%c0_6, %c0_7], %6 {strides = array<i32>} : memref<64x256xf32, #tpu.memory_space<vmem>>, vector<64x256xf32>,
    %c0_8 = arith.constant 0 : index
    %c0_9 = arith.constant 0 : index
    %8 = vector.load %arg4[%c0_8, %c0_9] : memref<64x256xf32, #tpu.memory_space<vmem>>, vector<64x256xf32>
    %cst_10 = arith.constant 0.000000e+00 : f32
    %9 = vector.broadcast %cst_10 : f32 to vector<8x64xf32>
    %cst_11 = arith.constant 0.000000e+00 : f32
    %10 = vector.broadcast %cst_11 : f32 to vector<8x64xf32>
    %c0_12 = arith.constant 0 : index
    %c0_13 = arith.constant 0 : index
    %11 = vector.load %arg13[%c0_12, %c0_13] : memref<64x256xf32, #tpu.memory_space<vmem>>, vector<8x256xf32>
    %cst_14 = arith.constant dense<0.000000e+00> : vector<8x256xf32>
    %12 = tpu.matmul %9, %8, %cst_14 {dimension_numbers = #tpu.dot_dimension_numbers<[1], [0], [0], [1], [0, 0, 1, 1], [], []>} : vector<8x64xf32>, vector<64x256xf32>, vector<8x256xf32> -> vector<8x256xf32>
    %13 = arith.addf %11, %12 : vector<8x256xf32>
    %14 = vector.extract_strided_slice %13 {offsets = [0, 0], sizes = [8, 192], strides = [1, 1]} : vector<8x256xf32> to vector<8x192xf32>
    %15 = arith.negf %14 : vector<8x192xf32>
    %16 = math.exp %15 : vector<8x192xf32>
    %cst_15 = arith.constant 1.000000e+00 : f32
    %17 = vector.broadcast %cst_15 : f32 to vector<8x192xf32>
    %18 = arith.addf %17, %16 : vector<8x192xf32>
    %19 = arith.divf %17, %18 : vector<8x192xf32>
    %20 = vector.extract_strided_slice %13 {offsets = [0, 192], sizes = [8, 64], strides = [1, 1]} : vector<8x256xf32> to vector<8x64xf32>
    %21 = math.tanh %20 : vector<8x64xf32>
    %22 = vector.extract_strided_slice %19 {offsets = [0, 0], sizes = [8, 64], strides = [1, 1]} : vector<8x192xf32> to vector<8x64xf32>
    %23 = vector.extract_strided_slice %19 {offsets = [0, 64], sizes = [8, 64], strides = [1, 1]} : vector<8x192xf32> to vector<8x64xf32>
    %24 = vector.extract_strided_slice %19 {offsets = [0, 128], sizes = [8, 64], strides = [1, 1]} : vector<8x192xf32> to vector<8x64xf32>
    %25 = arith.mulf %23, %10 : vector<8x64xf32>
    %26 = arith.mulf %22, %21 : vector<8x64xf32>
    %27 = arith.addf %25, %26 : vector<8x64xf32>
    %28 = math.tanh %27 : vector<8x64xf32>
    %29 = arith.mulf %24, %28 : vector<8x64xf32>
    %30 = vector.extract_strided_slice %29 {offsets = [0, 0], sizes = [8, 32], strides = [1, 1]} : vector<8x64xf32> to vector<8x32xf32>
    %c0_16 = arith.constant 0 : index
    %c0_17 = arith.constant 0 : index
    %31 = vector.load %arg14[%c0_16, %c0_17] : memref<64x64xf32, #tpu.memory_space<vmem>>, vector<8x32xf32>
    tpu.vector_store %arg14[%c0_16, %c0_17], %30 {strides = array<i32>} : memref<64x64xf32, #tpu.memory_space<vmem>>, vector<8x32xf32>,
    %32 = vector.extract_strided_slice %29 {offsets = [0, 32], sizes = [8, 32], strides = [1, 1]} : vector<8x64xf32> to vector<8x32xf32>
    %c56 = arith.constant 56 : index
    %c32 = arith.constant 32 : index
    %33 = vector.load %arg14[%c56, %c32] : memref<64x64xf32, #tpu.memory_space<vmem>>, vector<8x32xf32>
    tpu.vector_store %arg14[%c56, %c32], %32 {strides = array<i32>} : memref<64x64xf32, #tpu.memory_space<vmem>>, vector<8x32xf32>,
    %c8 = arith.constant 8 : index
    %c0_18 = arith.constant 0 : index
    %34 = vector.load %arg13[%c8, %c0_18] : memref<64x256xf32, #tpu.memory_space<vmem>>, vector<8x256xf32>
    %cst_19 = arith.constant dense<0.000000e+00> : vector<8x256xf32>
    %35 = tpu.matmul %29, %8, %cst_19 {dimension_numbers = #tpu.dot_dimension_numbers<[1], [0], [0], [1], [0, 0, 1, 1], [], []>} : vector<8x64xf32>, vector<64x256xf32>, vector<8x256xf32> -> vector<8x256xf32>
    %36 = arith.addf %34, %35 : vector<8x256xf32>
    %37 = vector.extract_strided_slice %36 {offsets = [0, 0], sizes = [8, 192], strides = [1, 1]} : vector<8x256xf32> to vector<8x192xf32>
    %38 = arith.negf %37 : vector<8x192xf32>
    %39 = math.exp %38 : vector<8x192xf32>
    %cst_20 = arith.constant 1.000000e+00 : f32
    %40 = vector.broadcast %cst_20 : f32 to vector<8x192xf32>
    %41 = arith.addf %40, %39 : vector<8x192xf32>
    %42 = arith.divf %40, %41 : vector<8x192xf32>
    %43 = vector.extract_strided_slice %36 {offsets = [0, 192], sizes = [8, 64], strides = [1, 1]} : vector<8x256xf32> to vector<8x64xf32>
    %44 = math.tanh %43 : vector<8x64xf32>
    %45 = vector.extract_strided_slice %42 {offsets = [0, 0], sizes = [8, 64], strides = [1, 1]} : vector<8x192xf32> to vector<8x64xf32>
    %46 = vector.extract_strided_slice %42 {offsets = [0, 64], sizes = [8, 64], strides = [1, 1]} : vector<8x192xf32> to vector<8x64xf32>
    %47 = vector.extract_strided_slice %42 {offsets = [0, 128], sizes = [8, 64], strides = [1, 1]} : vector<8x192xf32> to vector<8x64xf32>
    %48 = arith.mulf %46, %27 : vector<8x64xf32>
    %49 = arith.mulf %45, %44 : vector<8x64xf32>
    %50 = arith.addf %48, %49 : vector<8x64xf32>
    %51 = math.tanh %50 : vector<8x64xf32>
    %52 = arith.mulf %47, %51 : vector<8x64xf32>
    %53 = vector.extract_strided_slice %52 {offsets = [0, 0], sizes = [8, 32], strides = [1, 1]} : vector<8x64xf32> to vector<8x32xf32>
    %c8_21 = arith.constant 8 : index
    %c0_22 = arith.constant 0 : index
    %54 = vector.load %arg14[%c8_21, %c0_22] : memref<64x64xf32, #tpu.memory_space<vmem>>, vector<8x32xf32>
    tpu.vector_store %arg14[%c8_21, %c0_22], %53 {strides = array<i32>} : memref<64x64xf32, #tpu.memory_space<vmem>>, vector<8x32xf32>,
    %55 = vector.extract_strided_slice %52 {offsets = [0, 32], sizes = [8, 32], strides = [1, 1]} : vector<8x64xf32> to vector<8x32xf32>
    %c48 = arith.constant 48 : index
    %c32_23 = arith.constant 32 : index
    %56 = vector.load %arg14[%c48, %c32_23] : memref<64x64xf32, #tpu.memory_space<vmem>>, vector<8x32xf32>
    tpu.vector_store %arg14[%c48, %c32_23], %55 {strides = array<i32>} : memref<64x64xf32, #tpu.memory_space<vmem>>, vector<8x32xf32>,
    %c16 = arith.constant 16 : index
    %c0_24 = arith.constant 0 : index
    %57 = vector.load %arg13[%c16, %c0_24] : memref<64x256xf32, #tpu.memory_space<vmem>>, vector<8x256xf32>
    %cst_25 = arith.constant dense<0.000000e+00> : vector<8x256xf32>
    %58 = tpu.matmul %52, %8, %cst_25 {dimension_numbers = #tpu.dot_dimension_numbers<[1], [0], [0], [1], [0, 0, 1, 1], [], []>} : vector<8x64xf32>, vector<64x256xf32>, vector<8x256xf32> -> vector<8x256xf32>
    %59 = arith.addf %57, %58 : vector<8x256xf32>
    %60 = vector.extract_strided_slice %59 {offsets = [0, 0], sizes = [8, 192], strides = [1, 1]} : vector<8x256xf32> to vector<8x192xf32>
    %61 = arith.negf %60 : vector<8x192xf32>
    %62 = math.exp %61 : vector<8x192xf32>
    %cst_26 = arith.constant 1.000000e+00 : f32
    %63 = vector.broadcast %cst_26 : f32 to vector<8x192xf32>
    %64 = arith.addf %63, %62 : vector<8x192xf32>
    %65 = arith.divf %63, %64 : vector<8x192xf32>
    %66 = vector.extract_strided_slice %59 {offsets = [0, 192], sizes = [8, 64], strides = [1, 1]} : vector<8x256xf32> to vector<8x64xf32>
    %67 = math.tanh %66 : vector<8x64xf32>
    %68 = vector.extract_strided_slice %65 {offsets = [0, 0], sizes = [8, 64], strides = [1, 1]} : vector<8x192xf32> to vector<8x64xf32>
    %69 = vector.extract_strided_slice %65 {offsets = [0, 64], sizes = [8, 64], strides = [1, 1]} : vector<8x192xf32> to vector<8x64xf32>
    %70 = vector.extract_strided_slice %65 {offsets = [0, 128], sizes = [8, 64], strides = [1, 1]} : vector<8x192xf32> to vector<8x64xf32>
    %71 = arith.mulf %69, %50 : vector<8x64xf32>
    %72 = arith.mulf %68, %67 : vector<8x64xf32>
    %73 = arith.addf %71, %72 : vector<8x64xf32>
    %74 = math.tanh %73 : vector<8x64xf32>
    %75 = arith.mulf %70, %74 : vector<8x64xf32>
    %76 = vector.extract_strided_slice %75 {offsets = [0, 0], sizes = [8, 32], strides = [1, 1]} : vector<8x64xf32> to vector<8x32xf32>
    %c16_27 = arith.constant 16 : index
    %c0_28 = arith.constant 0 : index
    %77 = vector.load %arg14[%c16_27, %c0_28] : memref<64x64xf32, #tpu.memory_space<vmem>>, vector<8x32xf32>
    tpu.vector_store %arg14[%c16_27, %c0_28], %76 {strides = array<i32>} : memref<64x64xf32, #tpu.memory_space<vmem>>, vector<8x32xf32>,
    %78 = vector.extract_strided_slice %75 {offsets = [0, 32], sizes = [8, 32], strides = [1, 1]} : vector<8x64xf32> to vector<8x32xf32>
    %c40 = arith.constant 40 : index
    %c32_29 = arith.constant 32 : index
    %79 = vector.load %arg14[%c40, %c32_29] : memref<64x64xf32, #tpu.memory_space<vmem>>, vector<8x32xf32>
    tpu.vector_store %arg14[%c40, %c32_29], %78 {strides = array<i32>} : memref<64x64xf32, #tpu.memory_space<vmem>>, vector<8x32xf32>,
    %c24 = arith.constant 24 : index
    %c0_30 = arith.constant 0 : index
    %80 = vector.load %arg13[%c24, %c0_30] : memref<64x256xf32, #tpu.memory_space<vmem>>, vector<8x256xf32>
    %cst_31 = arith.constant dense<0.000000e+00> : vector<8x256xf32>
    %81 = tpu.matmul %75, %8, %cst_31 {dimension_numbers = #tpu.dot_dimension_numbers<[1], [0], [0], [1], [0, 0, 1, 1], [], []>} : vector<8x64xf32>, vector<64x256xf32>, vector<8x256xf32> -> vector<8x256xf32>
    %82 = arith.addf %80, %81 : vector<8x256xf32>
    %83 = vector.extract_strided_slice %82 {offsets = [0, 0], sizes = [8, 192], strides = [1, 1]} : vector<8x256xf32> to vector<8x192xf32>
    %84 = arith.negf %83 : vector<8x192xf32>
    %85 = math.exp %84 : vector<8x192xf32>
    %cst_32 = arith.constant 1.000000e+00 : f32
    %86 = vector.broadcast %cst_32 : f32 to vector<8x192xf32>
    %87 = arith.addf %86, %85 : vector<8x192xf32>
    %88 = arith.divf %86, %87 : vector<8x192xf32>
    %89 = vector.extract_strided_slice %82 {offsets = [0, 192], sizes = [8, 64], strides = [1, 1]} : vector<8x256xf32> to vector<8x64xf32>
    %90 = math.tanh %89 : vector<8x64xf32>
    %91 = vector.extract_strided_slice %88 {offsets = [0, 0], sizes = [8, 64], strides = [1, 1]} : vector<8x192xf32> to vector<8x64xf32>
    %92 = vector.extract_strided_slice %88 {offsets = [0, 64], sizes = [8, 64], strides = [1, 1]} : vector<8x192xf32> to vector<8x64xf32>
    %93 = vector.extract_strided_slice %88 {offsets = [0, 128], sizes = [8, 64], strides = [1, 1]} : vector<8x192xf32> to vector<8x64xf32>
    %94 = arith.mulf %92, %73 : vector<8x64xf32>
    %95 = arith.mulf %91, %90 : vector<8x64xf32>
    %96 = arith.addf %94, %95 : vector<8x64xf32>
    %97 = math.tanh %96 : vector<8x64xf32>
    %98 = arith.mulf %93, %97 : vector<8x64xf32>
    %99 = vector.extract_strided_slice %98 {offsets = [0, 0], sizes = [8, 32], strides = [1, 1]} : vector<8x64xf32> to vector<8x32xf32>
    %c24_33 = arith.constant 24 : index
    %c0_34 = arith.constant 0 : index
    %100 = vector.load %arg14[%c24_33, %c0_34] : memref<64x64xf32, #tpu.memory_space<vmem>>, vector<8x32xf32>
    tpu.vector_store %arg14[%c24_33, %c0_34], %99 {strides = array<i32>} : memref<64x64xf32, #tpu.memory_space<vmem>>, vector<8x32xf32>,
    %101 = vector.extract_strided_slice %98 {offsets = [0, 32], sizes = [8, 32], strides = [1, 1]} : vector<8x64xf32> to vector<8x32xf32>
    %c32_35 = arith.constant 32 : index
    %c32_36 = arith.constant 32 : index
    %102 = vector.load %arg14[%c32_35, %c32_36] : memref<64x64xf32, #tpu.memory_space<vmem>>, vector<8x32xf32>
    tpu.vector_store %arg14[%c32_35, %c32_36], %101 {strides = array<i32>} : memref<64x64xf32, #tpu.memory_space<vmem>>, vector<8x32xf32>,
    %c32_37 = arith.constant 32 : index
    %c0_38 = arith.constant 0 : index
    %103 = vector.load %arg13[%c32_37, %c0_38] : memref<64x256xf32, #tpu.memory_space<vmem>>, vector<8x256xf32>
    %cst_39 = arith.constant dense<0.000000e+00> : vector<8x256xf32>
    %104 = tpu.matmul %98, %8, %cst_39 {dimension_numbers = #tpu.dot_dimension_numbers<[1], [0], [0], [1], [0, 0, 1, 1], [], []>} : vector<8x64xf32>, vector<64x256xf32>, vector<8x256xf32> -> vector<8x256xf32>
    %105 = arith.addf %103, %104 : vector<8x256xf32>
    %106 = vector.extract_strided_slice %105 {offsets = [0, 0], sizes = [8, 192], strides = [1, 1]} : vector<8x256xf32> to vector<8x192xf32>
    %107 = arith.negf %106 : vector<8x192xf32>
    %108 = math.exp %107 : vector<8x192xf32>
    %cst_40 = arith.constant 1.000000e+00 : f32
    %109 = vector.broadcast %cst_40 : f32 to vector<8x192xf32>
    %110 = arith.addf %109, %108 : vector<8x192xf32>
    %111 = arith.divf %109, %110 : vector<8x192xf32>
    %112 = vector.extract_strided_slice %105 {offsets = [0, 192], sizes = [8, 64], strides = [1, 1]} : vector<8x256xf32> to vector<8x64xf32>
    %113 = math.tanh %112 : vector<8x64xf32>
    %114 = vector.extract_strided_slice %111 {offsets = [0, 0], sizes = [8, 64], strides = [1, 1]} : vector<8x192xf32> to vector<8x64xf32>
    %115 = vector.extract_strided_slice %111 {offsets = [0, 64], sizes = [8, 64], strides = [1, 1]} : vector<8x192xf32> to vector<8x64xf32>
    %116 = vector.extract_strided_slice %111 {offsets = [0, 128], sizes = [8, 64], strides = [1, 1]} : vector<8x192xf32> to vector<8x64xf32>
    %117 = arith.mulf %115, %96 : vector<8x64xf32>
    %118 = arith.mulf %114, %113 : vector<8x64xf32>
    %119 = arith.addf %117, %118 : vector<8x64xf32>
    %120 = math.tanh %119 : vector<8x64xf32>
    %121 = arith.mulf %116, %120 : vector<8x64xf32>
    %122 = vector.extract_strided_slice %121 {offsets = [0, 0], sizes = [8, 32], strides = [1, 1]} : vector<8x64xf32> to vector<8x32xf32>
    %c32_41 = arith.constant 32 : index
    %c0_42 = arith.constant 0 : index
    %123 = vector.load %arg14[%c32_41, %c0_42] : memref<64x64xf32, #tpu.memory_space<vmem>>, vector<8x32xf32>
    tpu.vector_store %arg14[%c32_41, %c0_42], %122 {strides = array<i32>} : memref<64x64xf32, #tpu.memory_space<vmem>>, vector<8x32xf32>,
    %124 = vector.extract_strided_slice %121 {offsets = [0, 32], sizes = [8, 32], strides = [1, 1]} : vector<8x64xf32> to vector<8x32xf32>
    %c24_43 = arith.constant 24 : index
    %c32_44 = arith.constant 32 : index
    %125 = vector.load %arg14[%c24_43, %c32_44] : memref<64x64xf32, #tpu.memory_space<vmem>>, vector<8x32xf32>
    tpu.vector_store %arg14[%c24_43, %c32_44], %124 {strides = array<i32>} : memref<64x64xf32, #tpu.memory_space<vmem>>, vector<8x32xf32>,
    %c40_45 = arith.constant 40 : index
    %c0_46 = arith.constant 0 : index
    %126 = vector.load %arg13[%c40_45, %c0_46] : memref<64x256xf32, #tpu.memory_space<vmem>>, vector<8x256xf32>
    %cst_47 = arith.constant dense<0.000000e+00> : vector<8x256xf32>
    %127 = tpu.matmul %121, %8, %cst_47 {dimension_numbers = #tpu.dot_dimension_numbers<[1], [0], [0], [1], [0, 0, 1, 1], [], []>} : vector<8x64xf32>, vector<64x256xf32>, vector<8x256xf32> -> vector<8x256xf32>
    %128 = arith.addf %126, %127 : vector<8x256xf32>
    %129 = vector.extract_strided_slice %128 {offsets = [0, 0], sizes = [8, 192], strides = [1, 1]} : vector<8x256xf32> to vector<8x192xf32>
    %130 = arith.negf %129 : vector<8x192xf32>
    %131 = math.exp %130 : vector<8x192xf32>
    %cst_48 = arith.constant 1.000000e+00 : f32
    %132 = vector.broadcast %cst_48 : f32 to vector<8x192xf32>
    %133 = arith.addf %132, %131 : vector<8x192xf32>
    %134 = arith.divf %132, %133 : vector<8x192xf32>
    %135 = vector.extract_strided_slice %128 {offsets = [0, 192], sizes = [8, 64], strides = [1, 1]} : vector<8x256xf32> to vector<8x64xf32>
    %136 = math.tanh %135 : vector<8x64xf32>
    %137 = vector.extract_strided_slice %134 {offsets = [0, 0], sizes = [8, 64], strides = [1, 1]} : vector<8x192xf32> to vector<8x64xf32>
    %138 = vector.extract_strided_slice %134 {offsets = [0, 64], sizes = [8, 64], strides = [1, 1]} : vector<8x192xf32> to vector<8x64xf32>
    %139 = vector.extract_strided_slice %134 {offsets = [0, 128], sizes = [8, 64], strides = [1, 1]} : vector<8x192xf32> to vector<8x64xf32>
    %140 = arith.mulf %138, %119 : vector<8x64xf32>
    %141 = arith.mulf %137, %136 : vector<8x64xf32>
    %142 = arith.addf %140, %141 : vector<8x64xf32>
    %143 = math.tanh %142 : vector<8x64xf32>
    %144 = arith.mulf %139, %143 : vector<8x64xf32>
    %145 = vector.extract_strided_slice %144 {offsets = [0, 0], sizes = [8, 32], strides = [1, 1]} : vector<8x64xf32> to vector<8x32xf32>
    %c40_49 = arith.constant 40 : index
    %c0_50 = arith.constant 0 : index
    %146 = vector.load %arg14[%c40_49, %c0_50] : memref<64x64xf32, #tpu.memory_space<vmem>>, vector<8x32xf32>
    tpu.vector_store %arg14[%c40_49, %c0_50], %145 {strides = array<i32>} : memref<64x64xf32, #tpu.memory_space<vmem>>, vector<8x32xf32>,
    %147 = vector.extract_strided_slice %144 {offsets = [0, 32], sizes = [8, 32], strides = [1, 1]} : vector<8x64xf32> to vector<8x32xf32>
    %c16_51 = arith.constant 16 : index
    %c32_52 = arith.constant 32 : index
    %148 = vector.load %arg14[%c16_51, %c32_52] : memref<64x64xf32, #tpu.memory_space<vmem>>, vector<8x32xf32>
    tpu.vector_store %arg14[%c16_51, %c32_52], %147 {strides = array<i32>} : memref<64x64xf32, #tpu.memory_space<vmem>>, vector<8x32xf32>,
    %c48_53 = arith.constant 48 : index
    %c0_54 = arith.constant 0 : index
    %149 = vector.load %arg13[%c48_53, %c0_54] : memref<64x256xf32, #tpu.memory_space<vmem>>, vector<8x256xf32>
    %cst_55 = arith.constant dense<0.000000e+00> : vector<8x256xf32>
    %150 = tpu.matmul %144, %8, %cst_55 {dimension_numbers = #tpu.dot_dimension_numbers<[1], [0], [0], [1], [0, 0, 1, 1], [], []>} : vector<8x64xf32>, vector<64x256xf32>, vector<8x256xf32> -> vector<8x256xf32>
    %151 = arith.addf %149, %150 : vector<8x256xf32>
    %152 = vector.extract_strided_slice %151 {offsets = [0, 0], sizes = [8, 192], strides = [1, 1]} : vector<8x256xf32> to vector<8x192xf32>
    %153 = arith.negf %152 : vector<8x192xf32>
    %154 = math.exp %153 : vector<8x192xf32>
    %cst_56 = arith.constant 1.000000e+00 : f32
    %155 = vector.broadcast %cst_56 : f32 to vector<8x192xf32>
    %156 = arith.addf %155, %154 : vector<8x192xf32>
    %157 = arith.divf %155, %156 : vector<8x192xf32>
    %158 = vector.extract_strided_slice %151 {offsets = [0, 192], sizes = [8, 64], strides = [1, 1]} : vector<8x256xf32> to vector<8x64xf32>
    %159 = math.tanh %158 : vector<8x64xf32>
    %160 = vector.extract_strided_slice %157 {offsets = [0, 0], sizes = [8, 64], strides = [1, 1]} : vector<8x192xf32> to vector<8x64xf32>
    %161 = vector.extract_strided_slice %157 {offsets = [0, 64], sizes = [8, 64], strides = [1, 1]} : vector<8x192xf32> to vector<8x64xf32>
    %162 = vector.extract_strided_slice %157 {offsets = [0, 128], sizes = [8, 64], strides = [1, 1]} : vector<8x192xf32> to vector<8x64xf32>
    %163 = arith.mulf %161, %142 : vector<8x64xf32>
    %164 = arith.mulf %160, %159 : vector<8x64xf32>
    %165 = arith.addf %163, %164 : vector<8x64xf32>
    %166 = math.tanh %165 : vector<8x64xf32>
    %167 = arith.mulf %162, %166 : vector<8x64xf32>
    %168 = vector.extract_strided_slice %167 {offsets = [0, 0], sizes = [8, 32], strides = [1, 1]} : vector<8x64xf32> to vector<8x32xf32>
    %c48_57 = arith.constant 48 : index
    %c0_58 = arith.constant 0 : index
    %169 = vector.load %arg14[%c48_57, %c0_58] : memref<64x64xf32, #tpu.memory_space<vmem>>, vector<8x32xf32>
    tpu.vector_store %arg14[%c48_57, %c0_58], %168 {strides = array<i32>} : memref<64x64xf32, #tpu.memory_space<vmem>>, vector<8x32xf32>,
    %170 = vector.extract_strided_slice %167 {offsets = [0, 32], sizes = [8, 32], strides = [1, 1]} : vector<8x64xf32> to vector<8x32xf32>
    %c8_59 = arith.constant 8 : index
    %c32_60 = arith.constant 32 : index
    %171 = vector.load %arg14[%c8_59, %c32_60] : memref<64x64xf32, #tpu.memory_space<vmem>>, vector<8x32xf32>
    tpu.vector_store %arg14[%c8_59, %c32_60], %170 {strides = array<i32>} : memref<64x64xf32, #tpu.memory_space<vmem>>, vector<8x32xf32>,
    %c56_61 = arith.constant 56 : index
    %c0_62 = arith.constant 0 : index
    %172 = vector.load %arg13[%c56_61, %c0_62] : memref<64x256xf32, #tpu.memory_space<vmem>>, vector<8x256xf32>
    %cst_63 = arith.constant dense<0.000000e+00> : vector<8x256xf32>
    %173 = tpu.matmul %167, %8, %cst_63 {dimension_numbers = #tpu.dot_dimension_numbers<[1], [0], [0], [1], [0, 0, 1, 1], [], []>} : vector<8x64xf32>, vector<64x256xf32>, vector<8x256xf32> -> vector<8x256xf32>
    %174 = arith.addf %172, %173 : vector<8x256xf32>
    %175 = vector.extract_strided_slice %174 {offsets = [0, 0], sizes = [8, 192], strides = [1, 1]} : vector<8x256xf32> to vector<8x192xf32>
    %176 = arith.negf %175 : vector<8x192xf32>
    %177 = math.exp %176 : vector<8x192xf32>
    %cst_64 = arith.constant 1.000000e+00 : f32
    %178 = vector.broadcast %cst_64 : f32 to vector<8x192xf32>
    %179 = arith.addf %178, %177 : vector<8x192xf32>
    %180 = arith.divf %178, %179 : vector<8x192xf32>
    %181 = vector.extract_strided_slice %174 {offsets = [0, 192], sizes = [8, 64], strides = [1, 1]} : vector<8x256xf32> to vector<8x64xf32>
    %182 = math.tanh %181 : vector<8x64xf32>
    %183 = vector.extract_strided_slice %180 {offsets = [0, 0], sizes = [8, 64], strides = [1, 1]} : vector<8x192xf32> to vector<8x64xf32>
    %184 = vector.extract_strided_slice %180 {offsets = [0, 64], sizes = [8, 64], strides = [1, 1]} : vector<8x192xf32> to vector<8x64xf32>
    %185 = vector.extract_strided_slice %180 {offsets = [0, 128], sizes = [8, 64], strides = [1, 1]} : vector<8x192xf32> to vector<8x64xf32>
    %186 = arith.mulf %184, %165 : vector<8x64xf32>
    %187 = arith.mulf %183, %182 : vector<8x64xf32>
    %188 = arith.addf %186, %187 : vector<8x64xf32>
    %189 = math.tanh %188 : vector<8x64xf32>
    %190 = arith.mulf %185, %189 : vector<8x64xf32>
    %191 = vector.extract_strided_slice %190 {offsets = [0, 0], sizes = [8, 32], strides = [1, 1]} : vector<8x64xf32> to vector<8x32xf32>
    %c56_65 = arith.constant 56 : index
    %c0_66 = arith.constant 0 : index
    %192 = vector.load %arg14[%c56_65, %c0_66] : memref<64x64xf32, #tpu.memory_space<vmem>>, vector<8x32xf32>
    tpu.vector_store %arg14[%c56_65, %c0_66], %191 {strides = array<i32>} : memref<64x64xf32, #tpu.memory_space<vmem>>, vector<8x32xf32>,
    %193 = vector.extract_strided_slice %190 {offsets = [0, 32], sizes = [8, 32], strides = [1, 1]} : vector<8x64xf32> to vector<8x32xf32>
    %c0_67 = arith.constant 0 : index
    %c32_68 = arith.constant 32 : index
    %194 = vector.load %arg14[%c0_67, %c32_68] : memref<64x64xf32, #tpu.memory_space<vmem>>, vector<8x32xf32>
    tpu.vector_store %arg14[%c0_67, %c32_68], %193 {strides = array<i32>} : memref<64x64xf32, #tpu.memory_space<vmem>>, vector<8x32xf32>,
    %195 = tpu.concatenate %190, %188 in 1 : vector<8x64xf32>, vector<8x64xf32> -> vector<8x128xf32>
    %c0_69 = arith.constant 0 : index
    %c0_70 = arith.constant 0 : index
    %196 = vector.load %arg12[%c0_69, %c0_70] : memref<8x128xf32, #tpu.memory_space<vmem>>, vector<8x128xf32>
    tpu.vector_store %arg12[%c0_69, %c0_70], %195 {strides = array<i32>} : memref<8x128xf32, #tpu.memory_space<vmem>>, vector<8x128xf32>,
    %c0_71 = arith.constant 0 : index
    %c0_72 = arith.constant 0 : index
    %197 = vector.load %arg14[%c0_71, %c0_72] : memref<64x64xf32, #tpu.memory_space<vmem>>, vector<64x64xf32>
    %c0_73 = arith.constant 0 : index
    %c0_74 = arith.constant 0 : index
    %198 = vector.load %arg5[%c0_73, %c0_74] : memref<64x64xf32, #tpu.memory_space<vmem>>, vector<64x64xf32>
    %cst_75 = arith.constant dense<0.000000e+00> : vector<64x64xf32>
    %199 = tpu.matmul %197, %198, %cst_75 {dimension_numbers = #tpu.dot_dimension_numbers<[1], [0], [0], [1], [0, 0, 1, 1], [], []>} : vector<64x64xf32>, vector<64x64xf32>, vector<64x64xf32> -> vector<64x64xf32>
    %c0_76 = arith.constant 0 : index
    %c0_77 = arith.constant 0 : index
    %200 = vector.load %arg6[%c0_76, %c0_77] : memref<1x64xf32, #tpu.memory_space<vmem>>, vector<1x64xf32>
    %201 = vector.broadcast %200 : vector<1x64xf32> to vector<64x64xf32>
    %202 = arith.addf %199, %201 : vector<64x64xf32>
    %cst_78 = arith.constant dense<0xFF800000> : vector<64xf32>
    %203 = vector.multi_reduction <maximumf>, %202, %cst_78 [1] : vector<64x64xf32> to vector<64xf32>
    %204 = vector.shape_cast %203 : vector<64xf32> to vector<64x1xf32>
    %205 = vector.broadcast %204 : vector<64x1xf32> to vector<64x64xf32>
    %206 = arith.subf %202, %205 : vector<64x64xf32>
    %207 = math.exp %206 : vector<64x64xf32>
    %cst_79 = arith.constant dense<0.000000e+00> : vector<64xf32>
    %208 = vector.multi_reduction <add>, %207, %cst_79 [1] : vector<64x64xf32> to vector<64xf32>
    %209 = vector.shape_cast %208 : vector<64xf32> to vector<64x1xf32>
    %210 = tpu.reciprocal %209 {approx = true} : vector<64x1xf32> -> vector<64x1xf32>
    %211 = vector.broadcast %210 : vector<64x1xf32> to vector<64x64xf32>
    %212 = arith.mulf %207, %211 : vector<64x64xf32>
    %213 = arith.mulf %212, %197 : vector<64x64xf32>
    %214 = vector.shape_cast %213 : vector<64x64xf32> to vector<8x8x64xf32>
    %cst_80 = arith.constant dense<0.000000e+00> : vector<8x64xf32>
    %215 = vector.multi_reduction <add>, %214, %cst_80 [0] : vector<8x8x64xf32> to vector<8x64xf32>
    %c0_81 = arith.constant 0 : index
    %c0_82 = arith.constant 0 : index
    %216 = vector.load %arg7[%c0_81, %c0_82] : memref<128x64xf32, #tpu.memory_space<vmem>>, vector<128x64xf32>
    %217 = vector.extract_strided_slice %216 {offsets = [0, 0], sizes = [64, 64], strides = [1, 1]} : vector<128x64xf32> to vector<64x64xf32>
    %cst_83 = arith.constant dense<0.000000e+00> : vector<8x64xf32>
    %218 = tpu.matmul %215, %217, %cst_83 {dimension_numbers = #tpu.dot_dimension_numbers<[1], [0], [0], [1], [0, 0, 1, 1], [], []>} : vector<8x64xf32>, vector<64x64xf32>, vector<8x64xf32> -> vector<8x64xf32>
    %c0_84 = arith.constant 0 : index
    %c0_85 = arith.constant 0 : index
    %219 = vector.load %arg8[%c0_84, %c0_85] : memref<1x64xf32, #tpu.memory_space<vmem>>, vector<1x64xf32>
    %220 = vector.broadcast %219 : vector<1x64xf32> to vector<8x64xf32>
    %221 = arith.addf %218, %220 : vector<8x64xf32>
    %222 = vector.extract_strided_slice %216 {offsets = [64, 0], sizes = [64, 64], strides = [1, 1]} : vector<128x64xf32> to vector<64x64xf32>
    %cst_86 = arith.constant dense<0.000000e+00> : vector<64x64xf32>
    %223 = tpu.matmul %197, %222, %cst_86 {dimension_numbers = #tpu.dot_dimension_numbers<[1], [0], [0], [1], [0, 0, 1, 1], [], []>} : vector<64x64xf32>, vector<64x64xf32>, vector<64x64xf32> -> vector<64x64xf32>
    %224 = vector.shape_cast %223 : vector<64x64xf32> to vector<8x8x64xf32>
    %225 = vector.shape_cast %221 : vector<8x64xf32> to vector<1x8x64xf32>
    %226 = vector.broadcast %225 : vector<1x8x64xf32> to vector<8x8x64xf32>
    %227 = arith.addf %224, %226 : vector<8x8x64xf32>
    %228 = vector.shape_cast %227 : vector<8x8x64xf32> to vector<64x64xf32>
    %c0_87 = arith.constant 0 : index
    %c0_88 = arith.constant 0 : index
    %229 = vector.load %arg9[%c0_87, %c0_88] : memref<64x128xf32, #tpu.memory_space<vmem>>, vector<64x128xf32>
    %cst_89 = arith.constant dense<0.000000e+00> : vector<64x128xf32>
    %230 = tpu.matmul %228, %229, %cst_89 {dimension_numbers = #tpu.dot_dimension_numbers<[1], [0], [0], [1], [0, 0, 1, 1], [], []>} : vector<64x64xf32>, vector<64x128xf32>, vector<64x128xf32> -> vector<64x128xf32>
    %c0_90 = arith.constant 0 : index
    %c0_91 = arith.constant 0 : index
    %231 = vector.load %arg10[%c0_90, %c0_91] : memref<1x128xf32, #tpu.memory_space<vmem>>, vector<1x128xf32>
    %232 = vector.broadcast %231 : vector<1x128xf32> to vector<64x128xf32>
    %233 = arith.addf %230, %232 : vector<64x128xf32>
    %cst_92 = arith.constant dense<0xFF800000> : vector<64xf32>
    %234 = vector.multi_reduction <maximumf>, %233, %cst_92 [1] : vector<64x128xf32> to vector<64xf32>
    %235 = vector.shape_cast %234 : vector<64xf32> to vector<64x1xf32>
    %236 = vector.broadcast %235 : vector<64x1xf32> to vector<64x128xf32>
    %237 = arith.subf %233, %236 : vector<64x128xf32>
    %238 = math.exp %237 : vector<64x128xf32>
    %cst_93 = arith.constant dense<0.000000e+00> : vector<64xf32>
    %239 = vector.multi_reduction <add>, %238, %cst_93 [1] : vector<64x128xf32> to vector<64xf32>
    %240 = vector.shape_cast %239 : vector<64xf32> to vector<64x1xf32>
    %241 = tpu.reciprocal %240 {approx = true} : vector<64x1xf32> -> vector<64x1xf32>
    %242 = vector.broadcast %241 : vector<64x1xf32> to vector<64x128xf32>
    %243 = arith.mulf %238, %242 : vector<64x128xf32>
    %c0_94 = arith.constant 0 : index
    %c0_95 = arith.constant 0 : index
    %c0_96 = arith.constant 0 : index
    %244 = vector.load %arg11[%c0_94, %c0_95, %c0_96] : memref<1x64x128xf32, #tpu.memory_space<vmem>>, vector<1x64x128xf32>
    %245 = vector.shape_cast %244 : vector<1x64x128xf32> to vector<64x128xf32>
    %246 = vector.shape_cast %243 : vector<64x128xf32> to vector<1x64x128xf32>
    tpu.vector_store %arg11[%c0_94, %c0_95, %c0_96], %246 {strides = array<i32>} : memref<1x64x128xf32, #tpu.memory_space<vmem>>, vector<1x64x128xf32>,
    return
  }
  func.func @transform_0(%arg0: i32) -> (i32, i32, i32) {
    %c0_i32 = arith.constant 0 : i32
    %c0_i32_0 = arith.constant 0 : i32
    %c0_i32_1 = arith.constant 0 : i32
    return %arg0, %c0_i32, %c0_i32_0 : i32, i32, i32
  }
  func.func @transform_1(%arg0: i32) -> (i32, i32) {
    %c0_i32 = arith.constant 0 : i32
    %c0_i32_0 = arith.constant 0 : i32
    %c0_i32_1 = arith.constant 0 : i32
    return %c0_i32, %c0_i32_0 : i32, i32
  }
  func.func @transform_2(%arg0: i32) -> (i32, i32) {
    %c0_i32 = arith.constant 0 : i32
    %c0_i32_0 = arith.constant 0 : i32
    %c0_i32_1 = arith.constant 0 : i32
    return %c0_i32, %c0_i32_0 : i32, i32
  }
  func.func @transform_3(%arg0: i32) -> (i32, i32) {
    %c0_i32 = arith.constant 0 : i32
    %c0_i32_0 = arith.constant 0 : i32
    %c0_i32_1 = arith.constant 0 : i32
    return %c0_i32, %c0_i32_0 : i32, i32
  }
  func.func @transform_4(%arg0: i32) -> (i32, i32) {
    %c0_i32 = arith.constant 0 : i32
    %c0_i32_0 = arith.constant 0 : i32
    %c0_i32_1 = arith.constant 0 : i32
    return %c0_i32, %c0_i32_0 : i32, i32
  }
  func.func @transform_5(%arg0: i32) -> (i32, i32) {
    %c0_i32 = arith.constant 0 : i32
    %c0_i32_0 = arith.constant 0 : i32
    %c0_i32_1 = arith.constant 0 : i32
    return %c0_i32, %c0_i32_0 : i32, i32
  }
  func.func @transform_6(%arg0: i32) -> (i32, i32) {
    %c0_i32 = arith.constant 0 : i32
    %c0_i32_0 = arith.constant 0 : i32
    %c0_i32_1 = arith.constant 0 : i32
    return %c0_i32, %c0_i32_0 : i32, i32
  }
  func.func @transform_7(%arg0: i32) -> (i32, i32) {
    %c0_i32 = arith.constant 0 : i32
    %c0_i32_0 = arith.constant 0 : i32
    %c0_i32_1 = arith.constant 0 : i32
    return %c0_i32, %c0_i32_0 : i32, i32
  }
  func.func @transform_8(%arg0: i32) -> (i32, i32) {
    %c0_i32 = arith.constant 0 : i32
    %c0_i32_0 = arith.constant 0 : i32
    %c0_i32_1 = arith.constant 0 : i32
    return %c0_i32, %c0_i32_0 : i32, i32
  }
  func.func @transform_9(%arg0: i32) -> (i32, i32) {
    %c0_i32 = arith.constant 0 : i32
    %c0_i32_0 = arith.constant 0 : i32
    %c0_i32_1 = arith.constant 0 : i32
    return %c0_i32, %c0_i32_0 : i32, i32
  }
  func.func @transform_10(%arg0: i32) -> (i32, i32, i32) {
    %c0_i32 = arith.constant 0 : i32
    %c0_i32_0 = arith.constant 0 : i32
    %c0_i32_1 = arith.constant 0 : i32
    return %arg0, %c0_i32, %c0_i32_0 : i32, i32, i32
  }
  func.func @transform_11(%arg0: i32) -> (i32, i32) {
    %c0_i32 = arith.constant 0 : i32
    %c0_i32_0 = arith.constant 0 : i32
    return %arg0, %c0_i32 : i32, i32
  }
}

</mosaic_0001>

<bundles_post_ra>
// kernel: gerador_pallas.1
= control target key start
LH: loop header
LB: loop body
LE: loop exit
PB: predicated region body
PF: predicated region fallthrough
CT: control target
= control target key end

     0   :  { %v2450_v3 = vmov 0.0   ;;  %vm73_vm0 = vcmask 523264   ;;  %v63_v57 = vlaneseq  ;;  %vm351_vm1 = vcmask 261120   ;;  %s3090_s1 = inlined_call_operand.vmem [shape: f32[64,256], index: 1, kind: input, shape index: {}]   ;;  %s3091_s3 = inlined_call_operand.vmem [shape: f32[64,256], index: 3, kind: input, shape index: {}]   ;;  %s3092_s0 = inlined_call_operand.vmem [shape: f32[1,64,64], index: 0, kind: input, shape index: {}]   ;;  %s3093_s2 = inlined_call_operand.vmem [shape: f32[1,256], index: 2, kind: input, shape index: {}]   ;;  %s3094_s4 = inlined_call_operand.vmem [shape: f32[64,64], index: 4, kind: input, shape index: {}]   ;;  %s3095_s11 = inlined_call_operand.vmem [shape: f32[8,128], index: 11, kind: output, shape index: {1}]   ;;  %s3096_s5 = inlined_call_operand.vmem [shape: f32[1,64], index: 5, kind: input, shape index: {}]   ;;  %s3097_s6 = inlined_call_operand.vmem [shape: f32[128,64], index: 6, kind: input, shape index: {}]   ;;  %s3098_s8 = inlined_call_operand.vmem [shape: f32[64,128], index: 8, kind: input, shape index: {}]   ;;  %s3099_s7 = inlined_call_operand.vmem [shape: f32[1,64], index: 7, kind: input, shape index: {}]   ;;  %s3100_s9 = inlined_call_operand.vmem [shape: f32[1,128], index: 9, kind: input, shape index: {}]   ;;  %s3101_s10 = inlined_call_operand.vmem [shape: f32[1,64,128], index: 10, kind: output, shape index: {0}]  }
   0x1   :  { %v46_v0 = vld [vmem:[%s3090_s1 + $0x8] sm:$0xff]  ;;  %v48_v1 = vld [vmem:[%s3090_s1 + $0x18] sm:$0xff]  ;;  %v45_v2 = vld [vmem:[%s3090_s1] sm:$0xff]  ;;  %162 = vmatprep.mubr.f32.mxu1 %v2450_v3  ;;  %424 = vmatprep.mubr.f32.mxu0 %v2450_v3  ;;  %vm353_vm2 = vcmask 523520   ;;  %vm2453_vm3 = vmmov 0  }
   0x2   :  { %v2050_v4 = vpack.c.bf16 %v48_v1, %v46_v0  ;;  %v47_v5 = vld [vmem:[%s3090_s1 + $0x10] sm:$0xff]  ;;  %v50_v6 = vld [vmem:[%s3090_s1 + $0x28] sm:$0xff]  ;;  %v52_v7 = vld [vmem:[%s3090_s1 + $0x38] sm:$0xff]  ;;  %v64_v58 = vshrl.u32 %v63_v57, 7 }
   0x3   :  { %v2052_v8 = vpack.c.bf16 %v47_v5, %v45_v2  ;;  %v2054_v9 = vpack.c.bf16 %v52_v7, %v50_v6  ;;  %v49_v10 = vld [vmem:[%s3090_s1 + $0x20] sm:$0xff]  ;;  %v51_v11 = vld [vmem:[%s3090_s1 + $0x30] sm:$0xff]  ;;  %v54_v12 = vld [vmem:[%s3090_s1 + $0x48] sm:$0xff] }
   0x4   :  { %2051 = vmatprep.subr.bf16.mxu1 %v2050_v4  ;;  %v56_v13 = vld [vmem:[%s3090_s1 + $0x58] sm:$0xff]  ;;  %v2056_v14 = vpack.c.bf16 %v51_v11, %v49_v10  ;;  %v53_v15 = vld [vmem:[%s3090_s1 + $0x40] sm:$0xff]  ;;  %v55_v16 = vld [vmem:[%s3090_s1 + $0x50] sm:$0xff]  ;;  %v65_v59 = vsub.s32 0, %v64_v58  ;;  %v69_v61 = vsub.s32 1, %v64_v58 }
   0x5   :  { %2053 = vmatpush1.bf16.msra.mxu1 %v2052_v8  ;;  %v2058_v17 = vpack.c.bf16 %v56_v13, %v54_v12  ;;  %v58_v18 = vld [vmem:[%s3090_s1 + $0x68] sm:$0xff]  ;;  %v60_v19 = vld [vmem:[%s3090_s1 + $0x78] sm:$0xff]  ;;  %v227_v22 = vld [vmem:[%s3091_s3] sm:$0xff]  ;;  %v2060_v26 = vpack.c.bf16 %v55_v16, %v53_v15 }
   0x6   :  { %2055 = vmatprep.subr.bf16.mxu1 %v2054_v9  ;;  %v228_v20 = vld [vmem:[%s3091_s3 + $0x8] sm:$0xff]  ;;  %v230_v21 = vld [vmem:[%s3091_s3 + $0x18] sm:$0xff]  ;;  %v229_v23 = vld [vmem:[%s3091_s3 + $0x10] sm:$0xff]  ;;  %v2062_v30 = vpack.c.bf16 %v60_v19, %v58_v18 }
   0x7   :  { %v2570_v24 = vpack.c.bf16 %v230_v21, %v228_v20  ;;  %v232_v25 = vld [vmem:[%s3091_s3 + $0x28] sm:$0xff]  ;;  %v57_v27 = vld [vmem:[%s3090_s1 + $0x60] sm:$0xff]  ;;  %v2578_v28 = vpack.c.bf16 %v229_v23, %v227_v22  ;;  %v234_v29 = vld [vmem:[%s3091_s3 + $0x38] sm:$0xff] }
   0x8   :  { %v59_v31 = vld [vmem:[%s3090_s1 + $0x70] sm:$0xff]  ;;  %v2586_v32 = vpack.c.bf16 %v234_v29, %v232_v25  ;;  %v231_v33 = vld [vmem:[%s3091_s3 + $0x20] sm:$0xff]  ;;  %v236_v35 = vld [vmem:[%s3091_s3 + $0x48] sm:$0xff] }
   0x9   :  { %2057 = vmatpush1.bf16.msra.mxu1 %v2056_v14  ;;  %v233_v34 = vld [vmem:[%s3091_s3 + $0x30] sm:$0xff]  ;;  %2083 = vmatprep.subr.bf16.mxu0 %v2570_v24  ;;  %v238_v36 = vld [vmem:[%s3091_s3 + $0x58] sm:$0xff]  ;;  %v2064_v37 = vpack.c.bf16 %v59_v31, %v57_v27  ;;  %v235_v40 = vld [vmem:[%s3091_s3 + $0x40] sm:$0xff] }
   0xa   :  { %2059 = vmatprep.subr.bf16.mxu1 %v2058_v17  ;;  %2085 = vmatpush1.bf16.msra.mxu0 %v2578_v28  ;;  %v2603_v38 = vpack.c.bf16 %v233_v34, %v231_v33  ;;  %v2605_v39 = vpack.c.bf16 %v238_v36, %v236_v35  ;;  %v237_v41 = vld [vmem:[%s3091_s3 + $0x50] sm:$0xff]  ;;  %v240_v42 = vld [vmem:[%s3091_s3 + $0x68] sm:$0xff]  ;;  %v242_v43 = vld [vmem:[%s3091_s3 + $0x78] sm:$0xff] }
   0xb   :  { %2087 = vmatprep.subr.bf16.mxu0 %v2586_v32  ;;  %v37_v44 = vld [vmem:[%s3092_s0] sm:$0xff]  ;;  %v2624_v45 = vpack.c.bf16 %v237_v41, %v235_v40  ;;  %v2627_v46 = vpack.c.bf16 %v242_v43, %v240_v42  ;;  %v241_v48 = vld [vmem:[%s3091_s3 + $0x70] sm:$0xff]  ;;  %v38_v49 = vld [vmem:[%s3092_s0 + $0x8] sm:$0xff] }
   0xc   :  { %v239_v47 = vld [vmem:[%s3091_s3 + $0x60] sm:$0xff]  ;;  %v39_v51 = vld [vmem:[%s3092_s0 + $0x10] sm:$0xff]  ;;  %v40_v52 = vld [vmem:[%s3092_s0 + $0x18] sm:$0xff] }
   0xd   :  { %2061 = vmatpush1.bf16.msra.mxu1 %v2060_v26  ;;  %v2643_v50 = vpack.c.bf16 %v241_v48, %v239_v47  ;;  %v41_v53 = vld [vmem:[%s3092_s0 + $0x20] sm:$0xff]  ;;  %v42_v54 = vld [vmem:[%s3092_s0 + $0x28] sm:$0xff]  ;;  %v43_v55 = vld [vmem:[%s3092_s0 + $0x30] sm:$0xff] }
   0xe   :  { %2063 = vmatprep.subr.bf16.mxu1 %v2062_v30  ;;  %2089 = vmatpush1.bf16.msra.mxu0 %v2603_v38  ;;  %v44_v56 = vld [vmem:[%s3092_s0 + $0x38] sm:$0xff]  ;;  %v61_v60 = vld [vmem:[%s3093_s2] sm:$0x3]  ;;  %s2451_s0 = smov 64  }
   0xf   :  { %2091 = vmatprep.subr.bf16.mxu0 %v2605_v39  ;;  %v66_v62 = vrot.slane %v61_v60, %v65_v59  ;;  %v70_v63 = vrot.slane %v61_v60, %v69_v61 }
  0x11   :  { %2065 = vmatpush1.bf16.msra.mxu1 %v2064_v37 }
  0x12   :  { %2067 = vmatprep.subr.bf16.mxu1 %v2570_v24  ;;  %2093 = vmatpush1.bf16.msra.mxu0 %v2624_v45 }
  0x13   :  { %2095 = vmatprep.subr.bf16.mxu0 %v2627_v46 }
  0x14   :  { %1831 = vmatmul.mubr.msk.f32.vlgmr.msra.gmra.mrb[0].mxu1 %vm73_vm0, %v37_v44 }
  0x15   :  { %2069 = vmatpush1.bf16.msra.mxu1 %v2578_v28  ;;  %168 = vmatprep.mubr.f32.mxu1 %v2450_v3 }
  0x16   :  { %2071 = vmatprep.subr.bf16.mxu1 %v2586_v32  ;;  %2097 = vmatpush1.bf16.msra.mxu0 %v2643_v50 }
  0x17   :  { %2099 = vmatprep.subr.bf16.mxu0 %v2570_v24 }
  0x18   :  { %1832 = vmatmul.mubr.msk.f32.gmra.mrb[2].mxu1 %vm73_vm0, %v38_v49 }
  0x19   :  { %174 = vmatprep.mubr.f32.mxu1 %v2450_v3  ;;  %2073 = vmatpush1.bf16.msra.mxu1 %v2603_v38 }
  0x1a   :  { %2075 = vmatprep.subr.bf16.mxu1 %v2605_v39 }
  0x1c   :  { %1833 = vmatmul.mubr.msk.f32.gmra.mrb[4].mxu1 %vm73_vm0, %v39_v51 }
  0x1d   :  { %180 = vmatprep.mubr.f32.mxu1 %v2450_v3  ;;  %2077 = vmatpush1.bf16.msra.mxu1 %v2624_v45 }
  0x1e   :  { %2079 = vmatprep.subr.bf16.mxu1 %v2627_v46 }
  0x20   :  { %1834 = vmatmul.mubr.msk.f32.gmra.mrb[6].mxu1 %vm73_vm0, %v40_v52 }
  0x21   :  { %186 = vmatprep.mubr.f32.mxu1 %v2450_v3  ;;  %2081 = vmatpush1.bf16.msra.mxu1 %v2643_v50 }
  0x24   :  { %1835 = vmatmul.mubr.msk.f32.gmra.mrb[8].mxu1 %vm73_vm0, %v41_v53 }
  0x25   :  { %192 = vmatprep.mubr.f32.mxu1 %v2450_v3 }
  0x28   :  { %1836 = vmatmul.mubr.msk.f32.gmra.mrb[10].mxu1 %vm73_vm0, %v42_v54 }
  0x29   :  { %198 = vmatprep.mubr.f32.mxu1 %v2450_v3 }
  0x2c   :  { %1837 = vmatmul.mubr.msk.f32.gmra.mrb[12].mxu1 %vm73_vm0, %v43_v55 }
  0x2d   :  { %204 = vmatprep.mubr.f32.mxu1 %v2450_v3 }
  0x30   :  { %1838 = vmatmul.mubr.msk.f32.gmra.mrb[14].mxu1 %vm73_vm0, %v44_v56 }
  0x31   :  { %312 = vmatprep.mubr.f32.mxu1 %v2450_v3 }
  0x34   :  { %313 = vmatmul.mubr.f32.vlgmr.msra.gmra.mrb[0].mxu1 %v2450_v3 }
  0xeb   :  { %v170_v0 = vpop.f32.mrb[2].mxu1 }
  0xec   :  { %v2689_v1 = vadd.f32 %v170_v0, %v66_v62  ;;  %v172_v2 = vpop.f32.mrb[3].mxu1 }
  0xed   :  { %v2691_v4 = vadd.f32 %v172_v2, %v70_v63 }
  0xef   :  { %v176_v5 = vpop.f32.mrb[4].mxu1 }
  0xf0   :  { %v2693_v6 = vadd.f32 %v176_v5, %v66_v62  ;;  %v178_v7 = vpop.f32.mrb[5].mxu1 }
  0xf1   :  { %v2695_v8 = vadd.f32 %v178_v7, %v70_v63 }
  0xf3   :  { %v182_v9 = vpop.f32.mrb[6].mxu1 }
  0xf4   :  { %v2697_v10 = vadd.f32 %v182_v9, %v66_v62  ;;  %v184_v11 = vpop.f32.mrb[7].mxu1 }
  0xf5   :  { %v2699_v12 = vadd.f32 %v184_v11, %v70_v63 }
  0xf7   :  { %v188_v13 = vpop.f32.mrb[8].mxu1 }
  0xf8   :  { %v2701_v14 = vadd.f32 %v188_v13, %v66_v62  ;;  %v190_v15 = vpop.f32.mrb[9].mxu1 }
  0xf9   :  { %v2703_v16 = vadd.f32 %v190_v15, %v70_v63 }
  0xfb   :  { %v194_v17 = vpop.f32.mrb[10].mxu1 }
  0xfc   :  { %v2705_v18 = vadd.f32 %v194_v17, %v66_v62  ;;  %v196_v19 = vpop.f32.mrb[11].mxu1 }
  0xfd   :  { %v2707_v20 = vadd.f32 %v196_v19, %v70_v63 }
  0xff   :  { %v200_v21 = vpop.f32.mrb[12].mxu1 }
 0x100   :  { %v2709_v22 = vadd.f32 %v200_v21, %v66_v62  ;;  %v202_v23 = vpop.f32.mrb[13].mxu1 }
 0x101   :  { %v2711_v25 = vadd.f32 %v202_v23, %v70_v63 }
 0x103   :  { %v206_v26 = vpop.f32.mrb[14].mxu1 }
 0x104   :  { %v2713_v27 = vadd.f32 %v206_v26, %v66_v62  ;;  %v208_v29 = vpop.f32.mrb[15].mxu1 }
 0x105   :  { %v2715_v30 = vadd.f32 %v208_v29, %v70_v63 }
 0x107   :  { %v314_v31 = vpop.f32.mrb[0].mxu1 }
 0x108   :  { %v316_v33 = vpop.f32.mrb[1].mxu1  ;;  %v2254_v36 = vadd.f32 %v314_v31, %v66_v62 }
 0x109   :  { %v2255_v34 = vadd.f32 %v316_v33, %v70_v63 }
 0x10a   :  { %v1839_v37 = vmul.f32 -1.442695, %v2254_v36 }
 0x10b   :  { %2290 = vtanh.f32 %v2255_v34  ;;  %v1840_v52 = vmul.f32 -1.442695, %v2255_v34 }
 0x10c   :  { %2292 = vpow2.f32 %v1839_v37 }
 0x115   :  { %v2291_v35 = vpop.eup %2290 }
 0x116   :  { %336 = vrot.lane.b32.xlu0 %v2291_v35, %s2451_s0  ;;  %v2293_v40 = vpop.eup %2292 }
 0x117   :  { %v327_v41 = vadd.f32 1.0, %v2293_v40 }
 0x119   :  { %2294 = vrcp.f32 %v327_v41 }
 0x123   :  { %v2295_v42 = vpop.eup %2294 }
 0x124   :  { %v334_v47 = vmul.f32 0.0, %v2295_v42 }
 0x188   :  { %v337_v43 = vpop.permute.xlu0 %336 }
 0x189   :  { %v339_v44 = vmul.f32 %v2295_v42, %v337_v43 }
 0x18b   :  { %341 = vrot.lane.b32.xlu0 %v339_v44, %s2451_s0 }
 0x1fd   :  { %v342_v48 = vpop.permute.xlu0 %341 }
 0x1fe   :  { %v344_v49 = vadd.f32 %v342_v48, %v334_v47 }
 0x200   :  { %2296 = vtanh.f32 %v344_v49 }
 0x201   :  { %2298 = vpow2.f32 %v1840_v52 }
 0x20a   :  { %v2297_v51 = vpop.eup %2296 }
 0x20b   :  { %347 = vrot.lane.b32.xlu1 %v2297_v51, %s2451_s0  ;;  %v2299_v53 = vpop.eup %2298 }
 0x20c   :  { %v328_v54 = vadd.f32 1.0, %v2299_v53 }
 0x20e   :  { %2300 = vrcp.f32 %v328_v54 }
 0x218   :  { %v2301_v55 = vpop.eup %2300 }
 0x27d   :  { %v348_v56 = vpop.permute.xlu1 %347 }
 0x27e   :  { %v350_v57 = vmul.f32 %v2301_v55, %v348_v56 }
 0x280   :  { %352 = vst.msk [vmem:[#allocation3] sm:$0xff] %vm351_vm1, %v350_v57  ;;  %1841 = vmatmul.mubr.msk.f32.vlgmr.msra.gmra.mrb[0].mxu0 %vm73_vm0, %v350_v57 }
 0x281   :  { %354 = vst.msk [vmem:[#allocation3 + $0x38] sm:$0xff] %vm353_vm2, %v350_v57  ;;  %2101 = vmatpush1.bf16.msra.mxu0 %v2578_v28  ;;  %534 = vmatprep.mubr.f32.mxu0 %v2450_v3 }
 0x282   :  { %2103 = vmatprep.subr.bf16.mxu0 %v2586_v32 }
 0x285   :  { %2105 = vmatpush1.bf16.msra.mxu0 %v2603_v38 }
 0x286   :  { %2107 = vmatprep.subr.bf16.mxu0 %v2605_v39 }
 0x289   :  { %2109 = vmatpush1.bf16.msra.mxu0 %v2624_v45 }
 0x28a   :  { %2111 = vmatprep.subr.bf16.mxu0 %v2627_v46 }
 0x28d   :  { %2113 = vmatpush1.bf16.msra.mxu0 %v2643_v50 }
 0x28e   :  { %2115 = vmatprep.subr.bf16.mxu0 %v2570_v24 }
 0x353   :  { %v426_v58 = vpop.f32.mrb[0].mxu0 }
 0x354   :  { %v431_v59 = vadd.f32 %v426_v58, %v2689_v1  ;;  %v428_v60 = vpop.f32.mrb[1].mxu0 }
 0x355   :  { %v432_v61 = vadd.f32 %v428_v60, %v2691_v4 }
 0x356   :  { %v1842_v63 = vmul.f32 -1.442695, %v431_v59 }
 0x357   :  { %2302 = vtanh.f32 %v432_v61  ;;  %v1843_v4 = vmul.f32 -1.442695, %v432_v61 }
 0x358   :  { %2304 = vpow2.f32 %v1842_v63 }
 0x361   :  { %v2303_v62 = vpop.eup %2302 }
 0x362   :  { %448 = vrot.lane.b32.xlu1 %v2303_v62, %s2451_s0  ;;  %v2305_v0 = vpop.eup %2304 }
 0x363   :  { %v439_v2 = vadd.f32 1.0, %v2305_v0 }
 0x365   :  { %2306 = vrcp.f32 %v439_v2 }
 0x36f   :  { %v2307_v5 = vpop.eup %2306 }
 0x370   :  { %v446_v11 = vmul.f32 %v2307_v5, %v344_v49 }
 0x3d4   :  { %v449_v7 = vpop.permute.xlu1 %448 }
 0x3d5   :  { %v451_v9 = vmul.f32 %v2307_v5, %v449_v7 }
 0x3d7   :  { %453 = vrot.lane.b32.xlu0 %v451_v9, %s2451_s0 }
 0x449   :  { %v454_v13 = vpop.permute.xlu0 %453 }
 0x44a   :  { %v456_v1 = vadd.f32 %v454_v13, %v446_v11 }
 0x44c   :  { %2308 = vtanh.f32 %v456_v1 }
 0x44d   :  { %2310 = vpow2.f32 %v1843_v4 }
 0x456   :  { %v2309_v15 = vpop.eup %2308 }
 0x457   :  { %459 = vrot.lane.b32.xlu1 %v2309_v15, %s2451_s0  ;;  %v2311_v17 = vpop.eup %2310 }
 0x458   :  { %v440_v19 = vadd.f32 1.0, %v2311_v17 }
 0x45a   :  { %2312 = vrcp.f32 %v440_v19 }
 0x464   :  { %v2313_v21 = vpop.eup %2312 }
 0x4c9   :  { %v460_v23 = vpop.permute.xlu1 %459 }
 0x4ca   :  { %v462_v26 = vmul.f32 %v2313_v21, %v460_v23 }
 0x4cc   :  { %463 = vst.msk [vmem:[#allocation3 + $0x8] sm:$0xff] %vm351_vm1, %v462_v26  ;;  %1844 = vmatmul.mubr.msk.f32.vlgmr.msra.gmra.mrb[2].mxu0 %vm73_vm0, %v462_v26 }
 0x4cd   :  { %464 = vst.msk [vmem:[#allocation3 + $0x30] sm:$0xff] %vm353_vm2, %v462_v26  ;;  %2117 = vmatpush1.bf16.msra.mxu0 %v2578_v28  ;;  %644 = vmatprep.mubr.f32.mxu0 %v2450_v3 }
 0x4ce   :  { %2119 = vmatprep.subr.bf16.mxu0 %v2586_v32 }
 0x4d1   :  { %2121 = vmatpush1.bf16.msra.mxu0 %v2603_v38 }
 0x4d2   :  { %2123 = vmatprep.subr.bf16.mxu0 %v2605_v39 }
 0x4d5   :  { %2125 = vmatpush1.bf16.msra.mxu0 %v2624_v45 }
 0x4d6   :  { %2127 = vmatprep.subr.bf16.mxu0 %v2627_v46 }
 0x4d9   :  { %2129 = vmatpush1.bf16.msra.mxu0 %v2643_v50 }
 0x4da   :  { %2131 = vmatprep.subr.bf16.mxu0 %v2570_v24 }
 0x59f   :  { %v536_v29 = vpop.f32.mrb[2].mxu0 }
 0x5a0   :  { %v541_v31 = vadd.f32 %v536_v29, %v2693_v6  ;;  %v538_v33 = vpop.f32.mrb[3].mxu0 }
 0x5a1   :  { %v542_v34 = vadd.f32 %v538_v33, %v2695_v8 }
 0x5a2   :  { %v1845_v36 = vmul.f32 -1.442695, %v541_v31 }
 0x5a3   :  { %2314 = vtanh.f32 %v542_v34  ;;  %v1846_v8 = vmul.f32 -1.442695, %v542_v34 }
 0x5a4   :  { %2316 = vpow2.f32 %v1845_v36 }
 0x5ad   :  { %v2315_v35 = vpop.eup %2314 }
 0x5ae   :  { %558 = vrot.lane.b32.xlu0 %v2315_v35, %s2451_s0  ;;  %v2317_v37 = vpop.eup %2316 }
 0x5af   :  { %v549_v40 = vadd.f32 1.0, %v2317_v37 }
 0x5b1   :  { %2318 = vrcp.f32 %v549_v40 }
 0x5bb   :  { %v2319_v41 = vpop.eup %2318 }
 0x5bc   :  { %v556_v44 = vmul.f32 %v2319_v41, %v456_v1 }
 0x620   :  { %v559_v42 = vpop.permute.xlu0 %558 }
 0x621   :  { %v561_v43 = vmul.f32 %v2319_v41, %v559_v42 }
 0x623   :  { %563 = vrot.lane.b32.xlu1 %v561_v43, %s2451_s0 }
 0x695   :  { %v564_v47 = vpop.permute.xlu1 %563 }
 0x696   :  { %v566_v6 = vadd.f32 %v564_v47, %v556_v44 }
 0x698   :  { %2320 = vtanh.f32 %v566_v6 }
 0x699   :  { %2322 = vpow2.f32 %v1846_v8 }
 0x6a2   :  { %v2321_v48 = vpop.eup %2320 }
 0x6a3   :  { %569 = vrot.lane.b32.xlu0 %v2321_v48, %s2451_s0  ;;  %v2323_v49 = vpop.eup %2322 }
 0x6a4   :  { %v550_v51 = vadd.f32 1.0, %v2323_v49 }
 0x6a6   :  { %2324 = vrcp.f32 %v550_v51 }
 0x6b0   :  { %v2325_v52 = vpop.eup %2324 }
 0x715   :  { %v570_v53 = vpop.permute.xlu0 %569 }
 0x716   :  { %v572_v54 = vmul.f32 %v2325_v52, %v570_v53 }
 0x718   :  { %573 = vst.msk [vmem:[#allocation3 + $0x10] sm:$0xff] %vm351_vm1, %v572_v54  ;;  %1847 = vmatmul.mubr.msk.f32.vlgmr.msra.gmra.mrb[4].mxu0 %vm73_vm0, %v572_v54 }
 0x719   :  { %574 = vst.msk [vmem:[#allocation3 + $0x28] sm:$0xff] %vm353_vm2, %v572_v54  ;;  %2133 = vmatpush1.bf16.msra.mxu0 %v2578_v28  ;;  %754 = vmatprep.mubr.f32.mxu0 %v2450_v3 }
 0x71a   :  { %2135 = vmatprep.subr.bf16.mxu0 %v2586_v32 }
 0x71d   :  { %2137 = vmatpush1.bf16.msra.mxu0 %v2603_v38 }
 0x71e   :  { %2139 = vmatprep.subr.bf16.mxu0 %v2605_v39 }
 0x721   :  { %2141 = vmatpush1.bf16.msra.mxu0 %v2624_v45 }
 0x722   :  { %2143 = vmatprep.subr.bf16.mxu0 %v2627_v46 }
 0x725   :  { %2145 = vmatpush1.bf16.msra.mxu0 %v2643_v50 }
 0x726   :  { %2147 = vmatprep.subr.bf16.mxu0 %v2570_v24 }
 0x7eb   :  { %v646_v55 = vpop.f32.mrb[4].mxu0 }
 0x7ec   :  { %v651_v56 = vadd.f32 %v646_v55, %v2697_v10  ;;  %v648_v57 = vpop.f32.mrb[5].mxu0 }
 0x7ed   :  { %v652_v58 = vadd.f32 %v648_v57, %v2699_v12 }
 0x7ee   :  { %v1848_v60 = vmul.f32 -1.442695, %v651_v56 }
 0x7ef   :  { %2326 = vtanh.f32 %v652_v58  ;;  %v1849_v12 = vmul.f32 -1.442695, %v652_v58 }
 0x7f0   :  { %2328 = vpow2.f32 %v1848_v60 }
 0x7f9   :  { %v2327_v59 = vpop.eup %2326 }
 0x7fa   :  { %668 = vrot.lane.b32.xlu1 %v2327_v59, %s2451_s0  ;;  %v2329_v61 = vpop.eup %2328 }
 0x7fb   :  { %v659_v62 = vadd.f32 1.0, %v2329_v61 }
 0x7fd   :  { %2330 = vrcp.f32 %v659_v62 }
 0x807   :  { %v2331_v63 = vpop.eup %2330 }
 0x808   :  { %v666_v5 = vmul.f32 %v2331_v63, %v566_v6 }
 0x86c   :  { %v669_v0 = vpop.permute.xlu1 %668 }
 0x86d   :  { %v671_v2 = vmul.f32 %v2331_v63, %v669_v0 }
 0x86f   :  { %673 = vrot.lane.b32.xlu0 %v671_v2, %s2451_s0 }
 0x8e1   :  { %v674_v7 = vpop.permute.xlu0 %673 }
 0x8e2   :  { %v676_v10 = vadd.f32 %v674_v7, %v666_v5 }
 0x8e4   :  { %2332 = vtanh.f32 %v676_v10 }
 0x8e5   :  { %2334 = vpow2.f32 %v1849_v12 }
 0x8ee   :  { %v2333_v9 = vpop.eup %2332 }
 0x8ef   :  { %679 = vrot.lane.b32.xlu1 %v2333_v9, %s2451_s0  ;;  %v2335_v11 = vpop.eup %2334 }
 0x8f0   :  { %v660_v13 = vadd.f32 1.0, %v2335_v11 }
 0x8f2   :  { %2336 = vrcp.f32 %v660_v13 }
 0x8fc   :  { %v2337_v1 = vpop.eup %2336 }
 0x961   :  { %v680_v15 = vpop.permute.xlu1 %679 }
 0x962   :  { %v682_v4 = vmul.f32 %v2337_v1, %v680_v15 }
 0x964   :  { %683 = vst.msk [vmem:[#allocation3 + $0x18] sm:$0xff] %vm351_vm1, %v682_v4  ;;  %1850 = vmatmul.mubr.msk.f32.vlgmr.msra.gmra.mrb[6].mxu0 %vm73_vm0, %v682_v4 }
 0x965   :  { %684 = vst.msk [vmem:[#allocation3 + $0x20] sm:$0xff] %vm353_vm2, %v682_v4  ;;  %2149 = vmatpush1.bf16.msra.mxu0 %v2578_v28  ;;  %864 = vmatprep.mubr.f32.mxu0 %v2450_v3 }
 0x966   :  { %2151 = vmatprep.subr.bf16.mxu0 %v2586_v32 }
 0x969   :  { %2153 = vmatpush1.bf16.msra.mxu0 %v2603_v38 }
 0x96a   :  { %2155 = vmatprep.subr.bf16.mxu0 %v2605_v39 }
 0x96d   :  { %2157 = vmatpush1.bf16.msra.mxu0 %v2624_v45 }
 0x96e   :  { %2159 = vmatprep.subr.bf16.mxu0 %v2627_v46 }
 0x971   :  { %2161 = vmatpush1.bf16.msra.mxu0 %v2643_v50 }
 0x972   :  { %2163 = vmatprep.subr.bf16.mxu0 %v2570_v24 }
 0xa37   :  { %v756_v17 = vpop.f32.mrb[6].mxu0 }
 0xa38   :  { %v761_v19 = vadd.f32 %v756_v17, %v2701_v14  ;;  %v758_v21 = vpop.f32.mrb[7].mxu0 }
 0xa39   :  { %v762_v23 = vadd.f32 %v758_v21, %v2703_v16 }
 0xa3a   :  { %v1851_v29 = vmul.f32 -1.442695, %v761_v19 }
 0xa3b   :  { %2338 = vtanh.f32 %v762_v23  ;;  %v1852_v16 = vmul.f32 -1.442695, %v762_v23 }
 0xa3c   :  { %2340 = vpow2.f32 %v1851_v29 }
 0xa45   :  { %v2339_v26 = vpop.eup %2338 }
 0xa46   :  { %778 = vrot.lane.b32.xlu0 %v2339_v26, %s2451_s0  ;;  %v2341_v31 = vpop.eup %2340 }
 0xa47   :  { %v769_v33 = vadd.f32 1.0, %v2341_v31 }
 0xa49   :  { %2342 = vrcp.f32 %v769_v33 }
 0xa53   :  { %v2343_v34 = vpop.eup %2342 }
 0xa54   :  { %v776_v37 = vmul.f32 %v2343_v34, %v676_v10 }
 0xab8   :  { %v779_v35 = vpop.permute.xlu0 %778 }
 0xab9   :  { %v781_v36 = vmul.f32 %v2343_v34, %v779_v35 }
 0xabb   :  { %783 = vrot.lane.b32.xlu1 %v781_v36, %s2451_s0 }
 0xb2d   :  { %v784_v40 = vpop.permute.xlu1 %783 }
 0xb2e   :  { %v786_v14 = vadd.f32 %v784_v40, %v776_v37 }
 0xb30   :  { %2344 = vtanh.f32 %v786_v14 }
 0xb31   :  { %2346 = vpow2.f32 %v1852_v16  ;;  %v1138_v16 = vld [vmem:[%s3094_s4 + $0x18] sm:$0xff] }
 0xb3a   :  { %v2345_v41 = vpop.eup %2344 }
 0xb3b   :  { %789 = vrot.lane.b32.xlu0 %v2345_v41, %s2451_s0  ;;  %v2347_v42 = vpop.eup %2346 }
 0xb3c   :  { %v770_v43 = vadd.f32 1.0, %v2347_v42 }
 0xb3e   :  { %2348 = vrcp.f32 %v770_v43 }
 0xb48   :  { %v2349_v44 = vpop.eup %2348 }
 0xbad   :  { %v790_v47 = vpop.permute.xlu0 %789 }
 0xbae   :  { %v792_v6 = vmul.f32 %v2349_v44, %v790_v47 }
 0xbb0   :  { %793 = vst.msk [vmem:[#allocation3 + $0x20] sm:$0xff] %vm351_vm1, %v792_v6  ;;  %1853 = vmatmul.mubr.msk.f32.vlgmr.msra.gmra.mrb[8].mxu0 %vm73_vm0, %v792_v6 }
 0xbb1   :  { %794 = vst.msk [vmem:[#allocation3 + $0x18] sm:$0xff] %vm353_vm2, %v792_v6  ;;  %2165 = vmatpush1.bf16.msra.mxu0 %v2578_v28  ;;  %974 = vmatprep.mubr.f32.mxu0 %v2450_v3  ;;  %v1139_v6 = vld [vmem:[%s3094_s4 + $0x20] sm:$0xff] }
 0xbb2   :  { %2167 = vmatprep.subr.bf16.mxu0 %v2586_v32 }
 0xbb5   :  { %2169 = vmatpush1.bf16.msra.mxu0 %v2603_v38 }
 0xbb6   :  { %2171 = vmatprep.subr.bf16.mxu0 %v2605_v39 }
 0xbb9   :  { %2173 = vmatpush1.bf16.msra.mxu0 %v2624_v45 }
 0xbba   :  { %2175 = vmatprep.subr.bf16.mxu0 %v2627_v46 }
 0xbbd   :  { %2177 = vmatpush1.bf16.msra.mxu0 %v2643_v50 }
 0xbbe   :  { %2179 = vmatprep.subr.bf16.mxu0 %v2570_v24 }
 0xc83   :  { %v866_v48 = vpop.f32.mrb[8].mxu0 }
 0xc84   :  { %v871_v8 = vadd.f32 %v866_v48, %v2705_v18  ;;  %v868_v49 = vpop.f32.mrb[9].mxu0  ;;  %v1140_v48 = vld [vmem:[%s3094_s4 + $0x28] sm:$0xff] }
 0xc85   :  { %v872_v51 = vadd.f32 %v868_v49, %v2707_v20  ;;  %v1141_v49 = vld [vmem:[%s3094_s4 + $0x30] sm:$0xff] }
 0xc86   :  { %v1854_v53 = vmul.f32 -1.442695, %v871_v8  ;;  %v2202_v8 = vpack.c.bf16 %v1140_v48, %v1139_v6 }
 0xc87   :  { %2350 = vtanh.f32 %v872_v51  ;;  %v1855_v20 = vmul.f32 -1.442695, %v872_v51  ;;  %v1142_v51 = vld [vmem:[%s3094_s4 + $0x38] sm:$0xff] }
 0xc88   :  { %2352 = vpow2.f32 %v1854_v53 }
 0xc91   :  { %v2351_v52 = vpop.eup %2350 }
 0xc92   :  { %888 = vrot.lane.b32.xlu1 %v2351_v52, %s2451_s0  ;;  %v2353_v54 = vpop.eup %2352  ;;  %v2206_v52 = vpack.c.bf16 %v1142_v51, %v1141_v49 }
 0xc93   :  { %v879_v55 = vadd.f32 1.0, %v2353_v54 }
 0xc95   :  { %2354 = vrcp.f32 %v879_v55 }
 0xc9f   :  { %v2355_v56 = vpop.eup %2354 }
 0xca0   :  { %v886_v24 = vmul.f32 %v2355_v56, %v786_v14  ;;  %v1137_v14 = vld [vmem:[%s3094_s4 + $0x10] sm:$0xff] }
 0xca1   :  { %v2198_v42 = vpack.c.bf16 %v1138_v16, %v1137_v14 }
 0xd04   :  { %v889_v57 = vpop.permute.xlu1 %888 }
 0xd05   :  { %v891_v58 = vmul.f32 %v2355_v56, %v889_v57 }
 0xd07   :  { %893 = vrot.lane.b32.xlu0 %v891_v58, %s2451_s0 }
 0xd79   :  { %v894_v59 = vpop.permute.xlu0 %893 }
 0xd7a   :  { %v896_v18 = vadd.f32 %v894_v59, %v886_v24 }
 0xd7c   :  { %2356 = vtanh.f32 %v896_v18 }
 0xd7d   :  { %2358 = vpow2.f32 %v1855_v20 }
 0xd86   :  { %v2357_v60 = vpop.eup %2356 }
 0xd87   :  { %899 = vrot.lane.b32.xlu1 %v2357_v60, %s2451_s0  ;;  %v2359_v61 = vpop.eup %2358 }
 0xd88   :  { %v880_v62 = vadd.f32 1.0, %v2359_v61  ;;  %v2871_v61 = vld [vmem:[#allocation3 + $0x18] sm:$0xff] }
 0xd8a   :  { %2360 = vrcp.f32 %v880_v62  ;;  %v2875_v62 = vld [vmem:[#allocation3 + $0x20] sm:$0xff] }
 0xd94   :  { %v2361_v63 = vpop.eup %2360 }
 0xdf9   :  { %v900_v0 = vpop.permute.xlu1 %899 }
 0xdfa   :  { %v902_v2 = vmul.f32 %v2361_v63, %v900_v0 }
 0xdfc   :  { %903 = vst.msk [vmem:[#allocation3 + $0x28] sm:$0xff] %vm351_vm1, %v902_v2  ;;  %1856 = vmatmul.mubr.msk.f32.vlgmr.msra.gmra.mrb[10].mxu0 %vm73_vm0, %v902_v2 }
 0xdfd   :  { %904 = vst.msk [vmem:[#allocation3 + $0x10] sm:$0xff] %vm353_vm2, %v902_v2  ;;  %2181 = vmatpush1.bf16.msra.mxu0 %v2578_v28  ;;  %1084 = vmatprep.mubr.f32.mxu0 %v2450_v3 }
 0xdfe   :  { %2183 = vmatprep.subr.bf16.mxu0 %v2586_v32 }
 0xe01   :  { %2185 = vmatpush1.bf16.msra.mxu0 %v2603_v38 }
 0xe02   :  { %2187 = vmatprep.subr.bf16.mxu0 %v2605_v39 }
 0xe03   :  { %v2879_v63 = vld [vmem:[#allocation3 + $0x28] sm:$0xff] }
 0xe04   :  { %v2867_v20 = vld [vmem:[#allocation3 + $0x10] sm:$0xff] }
 0xe05   :  { %2189 = vmatpush1.bf16.msra.mxu0 %v2624_v45 }
 0xe06   :  { %2191 = vmatprep.subr.bf16.mxu0 %v2627_v46 }
 0xe09   :  { %2193 = vmatpush1.bf16.msra.mxu0 %v2643_v50 }
 0xecf   :  { %v976_v5 = vpop.f32.mrb[10].mxu0 }
 0xed0   :  { %v981_v7 = vadd.f32 %v976_v5, %v2709_v22  ;;  %v978_v10 = vpop.f32.mrb[11].mxu0  ;;  %v1862_v5 = vld [vmem:[%s3096_s5] ss:$0 sm:$0xff] }
 0xed1   :  { %v982_v28 = vadd.f32 %v978_v10, %v2711_v25 }
 0xed2   :  { %v1857_v32 = vmul.f32 -1.442695, %v981_v7 }
 0xed3   :  { %2362 = vtanh.f32 %v982_v28  ;;  %v1858_v25 = vmul.f32 -1.442695, %v982_v28 }
 0xed4   :  { %2364 = vpow2.f32 %v1857_v32 }
 0xedd   :  { %v2363_v9 = vpop.eup %2362 }
 0xede   :  { %998 = vrot.lane.b32.xlu0 %v2363_v9, %s2451_s0  ;;  %v2365_v38 = vpop.eup %2364 }
 0xedf   :  { %v989_v39 = vadd.f32 1.0, %v2365_v38 }
 0xee1   :  { %2366 = vrcp.f32 %v989_v39 }
 0xeeb   :  { %v2367_v45 = vpop.eup %2366 }
 0xeec   :  { %v996_v50 = vmul.f32 %v2367_v45, %v896_v18 }
 0xf50   :  { %v999_v12 = vpop.permute.xlu0 %998 }
 0xf51   :  { %v1001_v46 = vmul.f32 %v2367_v45, %v999_v12 }
 0xf53   :  { %1003 = vrot.lane.b32.xlu1 %v1001_v46, %s2451_s0 }
 0xfc5   :  { %v1004_v11 = vpop.permute.xlu1 %1003 }
 0xfc6   :  { %v1006_v22 = vadd.f32 %v1004_v11, %v996_v50 }
 0xfc8   :  { %2368 = vtanh.f32 %v1006_v22 }
 0xfc9   :  { %2370 = vpow2.f32 %v1858_v25 }
 0xfd2   :  { %v2369_v13 = vpop.eup %2368 }
 0xfd3   :  { %1009 = vrot.lane.b32.xlu0 %v2369_v13, %s2451_s0  ;;  %v2371_v1 = vpop.eup %2370 }
 0xfd4   :  { %v990_v15 = vadd.f32 1.0, %v2371_v1 }
 0xfd6   :  { %2372 = vrcp.f32 %v990_v15 }
 0xfe0   :  { %v2373_v4 = vpop.eup %2372 }
0x1045   :  { %v1010_v17 = vpop.permute.xlu0 %1009 }
0x1046   :  { %v1012_v19 = vmul.f32 %v2373_v4, %v1010_v17 }
0x1048   :  { %1013 = vst.msk [vmem:[#allocation3 + $0x30] sm:$0xff] %vm351_vm1, %v1012_v19  ;;  %1859 = vmatmul.mubr.msk.f32.vlgmr.msra.gmra.mrb[12].mxu0 %vm73_vm0, %v1012_v19 }
0x1049   :  { %1014 = vst.msk [vmem:[#allocation3 + $0x8] sm:$0xff] %vm353_vm2, %v1012_v19 }
0x104f   :  { %v2883_v0 = vld [vmem:[#allocation3 + $0x30] sm:$0xff] }
0x1050   :  { %v2863_v60 = vld [vmem:[#allocation3 + $0x8] sm:$0xff] }
0x111b   :  { %v1086_v21 = vpop.f32.mrb[12].mxu0 }
0x111c   :  { %v1091_v23 = vadd.f32 %v1086_v21, %v2713_v27  ;;  %v1088_v26 = vpop.f32.mrb[13].mxu0  ;;  %v1135_v27 = vld [vmem:[%s3094_s4] sm:$0xff] }
0x111d   :  { %v1092_v29 = vadd.f32 %v1088_v26, %v2715_v30  ;;  %v1136_v30 = vld [vmem:[%s3094_s4 + $0x8] sm:$0xff] }
0x111e   :  { %v1860_v33 = vmul.f32 -1.442695, %v1091_v23  ;;  %v2194_v41 = vpack.c.bf16 %v1136_v30, %v1135_v27 }
0x111f   :  { %2374 = vtanh.f32 %v1092_v29  ;;  %v1861_v54 = vmul.f32 -1.442695, %v1092_v29 }
0x1120   :  { %2376 = vpow2.f32 %v1860_v33  ;;  %2195 = vmatprep.subr.bf16.mxu1 %v2194_v41 }
0x1121   :  { %2197 = vmatpush3.bf16.msra.mxu1 %v2194_v41 }
0x1122   :  { %2199 = vmatprep.subr.bf16.mxu1 %v2198_v42 }
0x1125   :  { %2201 = vmatpush3.bf16.msra.mxu1 %v2198_v42 }
0x1126   :  { %2203 = vmatprep.subr.bf16.mxu1 %v2202_v8 }
0x1129   :  { %v2375_v31 = vpop.eup %2374  ;;  %2205 = vmatpush3.bf16.msra.mxu1 %v2202_v8 }
0x112a   :  { %1108 = vrot.lane.b32.xlu1 %v2375_v31, %s2451_s0  ;;  %v2377_v34 = vpop.eup %2376  ;;  %2207 = vmatprep.subr.bf16.mxu1 %v2206_v52 }
0x112b   :  { %v1099_v35 = vadd.f32 1.0, %v2377_v34 }
0x112d   :  { %2378 = vrcp.f32 %v1099_v35  ;;  %2209 = vmatpush3.bf16.msra.mxu1 %v2206_v52 }
0x1137   :  { %v2379_v36 = vpop.eup %2378 }
0x1138   :  { %v1106_v43 = vmul.f32 %v2379_v36, %v1006_v22 }
0x119c   :  { %v1109_v37 = vpop.permute.xlu1 %1108 }
0x119d   :  { %v1111_v40 = vmul.f32 %v2379_v36, %v1109_v37 }
0x119f   :  { %1113 = vrot.lane.b32.xlu0 %v1111_v40, %s2451_s0 }
0x1211   :  { %v1114_v44 = vpop.permute.xlu0 %1113 }
0x1212   :  { %v1116_v47 = vadd.f32 %v1114_v44, %v1106_v43 }
0x1214   :  { %2380 = vtanh.f32 %v1116_v47 }
0x1215   :  { %2382 = vpow2.f32 %v1861_v54 }
0x121e   :  { %v2381_v53 = vpop.eup %2380 }
0x121f   :  { %1119 = vrot.lane.b32.xlu1 %v2381_v53, %s2451_s0  ;;  %v2383_v55 = vpop.eup %2382 }
0x1220   :  { %v1100_v56 = vadd.f32 1.0, %v2383_v55 }
0x1222   :  { %2384 = vrcp.f32 %v1100_v56 }
0x122c   :  { %v2385_v57 = vpop.eup %2384 }
0x1291   :  { %v1120_v58 = vpop.permute.xlu1 %1119 }
0x1292   :  { %v1122_v24 = vmul.f32 %v2385_v57, %v1120_v58 }
0x1294   :  { %1123 = vst.msk [vmem:[#allocation3 + $0x38] sm:$0xff] %vm351_vm1, %v1122_v24  ;;  %v1125_v59 = vsel %vm73_vm0, %v1122_v24, %v1116_v47 }
0x1295   :  { %1124 = vst.msk [vmem:[#allocation3] sm:$0xff] %vm353_vm2, %v1122_v24  ;;  %1126 = vst [vmem:[%s3095_s11] sm:$0xff] %v1125_v59 }
0x129b   :  { %v2887_v2 = vld [vmem:[#allocation3 + $0x38] sm:$0xff] }
0x129c   :  { %v2859_v18 = vld [vmem:[#allocation3] sm:$0xff] }
0x129d   :  { %1963 = vmatprep.mubr.msk.f32.mxu1 %vm73_vm0, %v2859_v18 }
0x129e   :  { %1964 = vmatmul.mubr.msk.f32.vlgmr.msra.gmra.mrb[16].mxu1 %vm73_vm0, %v2863_v60 }
0x129f   :  { %1966 = vmatprep.mubr.msk.f32.mxu1 %vm73_vm0, %v2867_v20 }
0x12a2   :  { %1967 = vmatmul.mubr.msk.f32.gmra.mrb[18].mxu1 %vm73_vm0, %v2871_v61 }
0x12a3   :  { %1969 = vmatprep.mubr.msk.f32.mxu1 %vm73_vm0, %v2875_v62 }
0x12a6   :  { %1970 = vmatmul.mubr.msk.f32.gmra.mrb[20].mxu1 %vm73_vm0, %v2879_v63 }
0x12a7   :  { %1972 = vmatprep.mubr.msk.f32.mxu1 %vm73_vm0, %v2883_v0 }
0x12aa   :  { %1973 = vmatmul.mubr.msk.f32.gmra.mrb[22].mxu1 %vm73_vm0, %v2887_v2 }
0x12ab   :  { %1991 = vmatprep.mubr.msk.f32.mxu1 %vm2453_vm3, %v2450_v3 }
0x1371   :  { %v1965_v7 = vpop.f32.mrb[16].mxu1 }
0x1372   :  { %v1246_v10 = vadd.f32 %v1965_v7, %v1862_v5  ;;  %v1240_v28 = vpop.f32.mrb[17].mxu1 }
0x1373   :  { %v1241_v9 = vadd.f32 %v1862_v5, %v1240_v28 }
0x1374   :  { %v1282_v32 = vsel %vm73_vm0, %v1246_v10, -inf }
0x1375   :  { %1283 = vmax.xlane.f32.xlu1 %v1282_v32  ;;  %v1968_v38 = vpop.f32.mrb[18].mxu1  ;;  %v1279_v39 = vsel %vm73_vm0, %v1241_v9, -inf }
0x1376   :  { %v1250_v45 = vpop.f32.mrb[19].mxu1  ;;  %1280 = vmax.xlane.f32.xlu0 %v1279_v39  ;;  %v1256_v46 = vadd.f32 %v1968_v38, %v1862_v5 }
0x1377   :  { %v1251_v12 = vadd.f32 %v1862_v5, %v1250_v45 }
0x1378   :  { %v1288_v4 = vsel %vm73_vm0, %v1256_v46, -inf }
0x1379   :  { %v1971_v50 = vpop.f32.mrb[20].mxu1  ;;  %v1285_v11 = vsel %vm73_vm0, %v1251_v12, -inf }
0x137a   :  { %v1260_v22 = vpop.f32.mrb[21].mxu1  ;;  %1286 = vmax.xlane.f32.xlu0 %v1285_v11  ;;  %v1266_v25 = vadd.f32 %v1971_v50, %v1862_v5  ;;  %v1391_v50 = vld [vmem:[%s3097_s6 + $0x8] sm:$0xff] }
0x137b   :  { %v1261_v13 = vadd.f32 %v1862_v5, %v1260_v22  ;;  %v2452_v22 = vmov 0.0|0.0  }
0x137c   :  { %v1294_v26 = vsel %vm73_vm0, %v1266_v25, -inf  ;;  %2210 = vmatprep.subr.bf16.mxu1 %v2452_v22 }
0x137d   :  { %v1974_v1 = vpop.f32.mrb[22].mxu1  ;;  %v1291_v15 = vsel %vm73_vm0, %v1261_v13, -inf }
0x137e   :  { %v1270_v17 = vpop.f32.mrb[23].mxu1  ;;  %1292 = vmax.xlane.f32.xlu1 %v1291_v15  ;;  %1289 = vmax.xlane.f32.xlu0 %v1288_v4  ;;  %v1276_v21 = vadd.f32 %v1974_v1, %v1862_v5  ;;  %v1394_v15 = vld [vmem:[%s3097_s6 + $0x20] sm:$0xff]  ;;  %v1395_v4 = vld [vmem:[%s3097_s6 + $0x28] sm:$0xff] }
0x137f   :  { %v1271_v19 = vadd.f32 %v1862_v5, %v1270_v17  ;;  %v2217_v17 = vpack.c.bf16 %v1395_v4, %v1394_v15 }
0x1380   :  { %v1300_v29 = vsel %vm73_vm0, %v1276_v21, -inf }
0x1381   :  { %v1297_v23 = vsel %vm73_vm0, %v1271_v19, -inf }
0x1382   :  { %1298 = vmax.xlane.f32.xlu1 %v1297_v23  ;;  %1295 = vmax.xlane.f32.xlu0 %v1294_v26  ;;  %v1398_v26 = vld [vmem:[%s3097_s6 + $0x40] sm:$0xff] }
0x1386   :  { %1301 = vmax.xlane.f32.xlu0 %v1300_v29  ;;  %v1399_v29 = vld [vmem:[%s3097_s6 + $0x48] sm:$0xff] }
0x1402   :  { %v1284_v31 = vpop.xlane.xlu1 %1283 }
0x1403   :  { %v1304_v33 = vsub.f32 %v1246_v10, %v1284_v31  ;;  %v1281_v34 = vpop.xlane.xlu0 %1280  ;;  %v2964_v31 = vpack.c.bf16 %v1399_v29, %v1398_v26  ;;  %v1404_v26 = vld [vmem:[%s3097_s6 + $0x70] sm:$0xff]  ;;  %v1405_v29 = vld [vmem:[%s3097_s6 + $0x78] sm:$0xff] }
0x1404   :  { %v1303_v35 = vsub.f32 %v1241_v9, %v1281_v34 }
0x1405   :  { %v1313_v36 = vmul.f32 1.442695, %v1304_v33 }
0x1406   :  { %v1311_v37 = vmul.f32 1.442695, %v1303_v35 }
0x1407   :  { %2386 = vpow2.f32 %v1313_v36  ;;  %v1287_v40 = vpop.xlane.xlu0 %1286 }
0x1408   :  { %2388 = vpow2.f32 %v1311_v37  ;;  %v1305_v27 = vsub.f32 %v1251_v12, %v1287_v40 }
0x140a   :  { %v1315_v30 = vmul.f32 1.442695, %v1305_v27 }
0x140b   :  { %v1293_v14 = vpop.xlane.xlu1 %1292  ;;  %v1290_v41 = vpop.xlane.xlu0 %1289 }
0x140c   :  { %2390 = vpow2.f32 %v1315_v30  ;;  %v1307_v16 = vsub.f32 %v1261_v13, %v1293_v14  ;;  %v1306_v42 = vsub.f32 %v1256_v46, %v1290_v41  ;;  %v1390_v46 = vld [vmem:[%s3097_s6] sm:$0xff]  ;;  %v1392_v13 = vld [vmem:[%s3097_s6 + $0x10] sm:$0xff] }
0x140d   :  { %v2211_v11 = vpack.c.bf16 %v1391_v50, %v1390_v46 }
0x140e   :  { %v1319_v43 = vmul.f32 1.442695, %v1307_v16  ;;  %v1317_v44 = vmul.f32 1.442695, %v1306_v42 }
0x140f   :  { %v1299_v47 = vpop.xlane.xlu1 %1298  ;;  %v1296_v6 = vpop.xlane.xlu0 %1295  ;;  %2212 = vmatpush3.bf16.msra.mxu1 %v2211_v11 }
0x1410   :  { %2392 = vpow2.f32 %v1319_v43  ;;  %v1309_v48 = vsub.f32 %v1271_v19, %v1299_v47  ;;  %v1308_v8 = vsub.f32 %v1266_v25, %v1296_v6  ;;  %2213 = vmatprep.subr.bf16.mxu1 %v2452_v22  ;;  %v1393_v25 = vld [vmem:[%s3097_s6 + $0x18] sm:$0xff]  ;;  %v1396_v19 = vld [vmem:[%s3097_s6 + $0x30] sm:$0xff] }
0x1411   :  { %v2902_v49 = vpop.eup %2386  ;;  %2394 = vpow2.f32 %v1317_v44  ;;  %v2214_v1 = vpack.c.bf16 %v1393_v25, %v1392_v13 }
0x1412   :  { %v2904_v51 = vpop.eup %2388  ;;  %v1323_v52 = vmul.f32 1.442695, %v1309_v48  ;;  %v1321_v53 = vmul.f32 1.442695, %v1308_v8  ;;  %v1330_v54 = vsel %vm73_vm0, %v2902_v49, 0.0 }
0x1413   :  { %1331 = vadd.xlane.f32.xlu0 %v1330_v54  ;;  %v1302_v55 = vpop.xlane.xlu0 %1301  ;;  %v1327_v56 = vsel %vm73_vm0, %v2904_v51, 0.0  ;;  %2215 = vmatpush3.bf16.msra.mxu1 %v2214_v1  ;;  %v1401_v1 = vld [vmem:[%s3097_s6 + $0x58] sm:$0xff] }
0x1414   :  { %2396 = vpow2.f32 %v1323_v52  ;;  %v1310_v57 = vsub.f32 %v1276_v21, %v1302_v55  ;;  %1328 = vadd.xlane.f32.xlu1 %v1327_v56  ;;  %2216 = vmatprep.subr.bf16.mxu1 %v2452_v22  ;;  %v1397_v21 = vld [vmem:[%s3097_s6 + $0x38] sm:$0xff] }
0x1415   :  { %2398 = vpow2.f32 %v1321_v53  ;;  %v2220_v23 = vpack.c.bf16 %v1397_v21, %v1396_v19  ;;  %v1403_v21 = vld [vmem:[%s3097_s6 + $0x68] sm:$0xff] }
0x1416   :  { %v2910_v58 = vpop.eup %2390  ;;  %v1325_v24 = vmul.f32 1.442695, %v1310_v57 }
0x1417   :  { %v1333_v59 = vsel %vm73_vm0, %v2910_v58, 0.0  ;;  %2218 = vmatpush3.bf16.msra.mxu1 %v2217_v17 }
0x1418   :  { %2400 = vpow2.f32 %v1325_v24  ;;  %1334 = vadd.xlane.f32.xlu1 %v1333_v59  ;;  %2219 = vmatprep.subr.bf16.mxu1 %v2452_v22 }
0x141a   :  { %v2914_v5 = vpop.eup %2392 }
0x141b   :  { %v2916_v7 = vpop.eup %2394  ;;  %v1339_v10 = vsel %vm73_vm0, %v2914_v5, 0.0  ;;  %2221 = vmatpush3.bf16.msra.mxu1 %v2220_v23 }
0x141c   :  { %1340 = vadd.xlane.f32.xlu1 %v1339_v10  ;;  %v1336_v28 = vsel %vm73_vm0, %v2916_v7, 0.0  ;;  %2223 = vmatprep.subr.bf16.mxu1 %v2964_v31 }
0x141d   :  { %1337 = vadd.xlane.f32.xlu0 %v1336_v28 }
0x141e   :  { %v2922_v9 = vpop.eup %2396 }
0x141f   :  { %v2924_v32 = vpop.eup %2398  ;;  %v1345_v38 = vsel %vm73_vm0, %v2922_v9, 0.0 }
0x1420   :  { %1346 = vadd.xlane.f32.xlu1 %v1345_v38  ;;  %v1342_v39 = vsel %vm73_vm0, %v2924_v32, 0.0 }
0x1421   :  { %1343 = vadd.xlane.f32.xlu0 %v1342_v39 }
0x1422   :  { %v2930_v45 = vpop.eup %2400 }
0x1423   :  { %v1348_v12 = vsel %vm73_vm0, %v2930_v45, 0.0 }
0x1425   :  { %1349 = vadd.xlane.f32.xlu0 %v1348_v12 }
0x14a0   :  { %v1332_v33 = vpop.xlane.xlu0 %1331 }
0x14a1   :  { %2402 = vrcp.f32 %v1332_v33  ;;  %v1329_v34 = vpop.xlane.xlu1 %1328  ;;  %v2234_v33 = vpack.c.bf16 %v1405_v29, %v1404_v26 }
0x14a2   :  { %2404 = vrcp.f32 %v1329_v34  ;;  %v1605_v34 = vld [vmem:[%s3098_s8 + $0x30] sm:$0xff] }
0x14a5   :  { %v1335_v35 = vpop.xlane.xlu1 %1334 }
0x14a6   :  { %2406 = vrcp.f32 %v1335_v35  ;;  %v1606_v35 = vld [vmem:[%s3098_s8 + $0x38] sm:$0xff] }
0x14a9   :  { %v1341_v36 = vpop.xlane.xlu1 %1340 }
0x14aa   :  { %2408 = vrcp.f32 %v1341_v36  ;;  %v1338_v37 = vpop.xlane.xlu0 %1337  ;;  %v2250_v36 = vpack.c.bf16 %v1606_v35, %v1605_v34 }
0x14ab   :  { %v2403_v40 = vpop.eup %2402  ;;  %2410 = vrcp.f32 %v1338_v37 }
0x14ac   :  { %v2405_v27 = vpop.eup %2404  ;;  %v1360_v30 = vmul.f32 %v2403_v40, %v2902_v49 }
0x14ad   :  { %v1359_v14 = vmul.f32 %v2405_v27, %v2904_v51  ;;  %v1347_v41 = vpop.xlane.xlu1 %1346  ;;  %v1871_v27 = vld [vmem:[%s3099_s7] ss:$0 sm:$0xff] }
0x14ae   :  { %2412 = vrcp.f32 %v1347_v41  ;;  %v1344_v3 = vpop.xlane.xlu0 %1343  ;;  %v1368_v42 = vmul.f32 %v1360_v30, %v2863_v60 }
0x14af   :  { %2414 = vrcp.f32 %v1344_v3  ;;  %v1367_v43 = vmul.f32 %v1359_v14, %v2859_v18 }
0x14b0   :  { %v2407_v16 = vpop.eup %2406  ;;  %v1376_v8 = vsel %vm73_vm0, %v1368_v42, 0.0 }
0x14b1   :  { %v1361_v44 = vmul.f32 %v2407_v16, %v2910_v58  ;;  %v1375_v49 = vsel %vm73_vm0, %v1367_v43, 0.0 }
0x14b2   :  { %v1350_v47 = vpop.xlane.xlu0 %1349  ;;  %v1377_v55 = vadd.f32 %v1376_v8, %v1375_v49 }
0x14b3   :  { %v1369_v6 = vmul.f32 %v1361_v44, %v2867_v20  ;;  %2416 = vrcp.f32 %v1350_v47 }
0x14b4   :  { %v2409_v48 = vpop.eup %2408 }
0x14b5   :  { %v2411_v51 = vpop.eup %2410  ;;  %v1363_v52 = vmul.f32 %v2409_v48, %v2914_v5  ;;  %v1378_v53 = vsel %vm73_vm0, %v1369_v6, 0.0 }
0x14b6   :  { %v1362_v54 = vmul.f32 %v2411_v51, %v2916_v7  ;;  %v1379_v59 = vadd.f32 %v1378_v53, %v1377_v55  ;;  %v1881_v55 = vld [vmem:[%s3100_s9] ss:$0 sm:$0xff] }
0x14b7   :  { %v1371_v57 = vmul.f32 %v1363_v52, %v2875_v62 }
0x14b8   :  { %v2413_v56 = vpop.eup %2412  ;;  %v1370_v58 = vmul.f32 %v1362_v54, %v2871_v61 }
0x14b9   :  { %v2415_v24 = vpop.eup %2414  ;;  %v1365_v10 = vmul.f32 %v2413_v56, %v2922_v9  ;;  %v1382_v5 = vsel %vm73_vm0, %v1371_v57, 0.0 }
0x14ba   :  { %v1380_v28 = vsel %vm73_vm0, %v1370_v58, 0.0  ;;  %v1364_v38 = vmul.f32 %v2415_v24, %v2924_v32  ;;  %v1400_v32 = vld [vmem:[%s3097_s6 + $0x50] sm:$0xff] }
0x14bb   :  { %v1381_v39 = vadd.f32 %v1380_v28, %v1379_v59  ;;  %v1373_v12 = vmul.f32 %v1365_v10, %v2883_v0  ;;  %v2226_v19 = vpack.c.bf16 %v1401_v1, %v1400_v32 }
0x14bc   :  { %v1372_v7 = vmul.f32 %v1364_v38, %v2879_v63 }
0x14bd   :  { %v2417_v46 = vpop.eup %2416  ;;  %v1383_v50 = vadd.f32 %v1382_v5, %v1381_v39  ;;  %v1386_v9 = vsel %vm73_vm0, %v1373_v12, 0.0 }
0x14be   :  { %v1384_v11 = vsel %vm73_vm0, %v1372_v7, 0.0  ;;  %v1366_v22 = vmul.f32 %v2417_v46, %v2930_v45  ;;  %v1402_v45 = vld [vmem:[%s3097_s6 + $0x60] sm:$0xff] }
0x14bf   :  { %v1385_v13 = vadd.f32 %v1384_v11, %v1383_v50  ;;  %v2230_v23 = vpack.c.bf16 %v1403_v21, %v1402_v45 }
0x14c0   :  { %v1374_v25 = vmul.f32 %v1366_v22, %v2887_v2 }
0x14c1   :  { %v1387_v15 = vadd.f32 %v1386_v9, %v1385_v13 }
0x14c2   :  { %v1388_v4 = vsel %vm73_vm0, %v1374_v25, 0.0 }
0x14c3   :  { %v1389_v17 = vadd.f32 %v1388_v4, %v1387_v15 }
0x14c5   :  { %1992 = vmatmul.mubr.msk.f32.vlgmr.msra.gmra.mrb[24].mxu1 %vm73_vm0, %v1389_v17 }
0x14c6   :  { %2225 = vmatpush3.bf16.msra.mxu1 %v2964_v31  ;;  %2010 = vmatprep.mubr.msk.f32.mxu1 %vm73_vm0, %v2859_v18  ;;  %v1599_v18 = vld [vmem:[%s3098_s8] sm:$0xff] }
0x14c7   :  { %2227 = vmatprep.subr.bf16.mxu1 %v2226_v19 }
0x14ca   :  { %2229 = vmatpush3.bf16.msra.mxu1 %v2226_v19 }
0x14cb   :  { %2231 = vmatprep.subr.bf16.mxu1 %v2230_v23 }
0x14ce   :  { %2233 = vmatpush3.bf16.msra.mxu1 %v2230_v23 }
0x14cf   :  { %2235 = vmatprep.subr.bf16.mxu1 %v2234_v33 }
0x14d2   :  { %2237 = vmatpush3.bf16.msra.mxu1 %v2234_v33 }
0x14d5   :  { %2011 = vmatmul.mubr.msk.f32.vlgmr.msra.gmra.mrb[26].mxu1 %vm73_vm0, %v2863_v60  ;;  %v1600_v60 = vld [vmem:[%s3098_s8 + $0x8] sm:$0xff] }
0x14d6   :  { %2013 = vmatprep.mubr.msk.f32.mxu1 %vm73_vm0, %v2867_v20  ;;  %v1601_v20 = vld [vmem:[%s3098_s8 + $0x10] sm:$0xff] }
0x14d9   :  { %2014 = vmatmul.mubr.msk.f32.gmra.mrb[28].mxu1 %vm73_vm0, %v2871_v61  ;;  %v2238_v61 = vpack.c.bf16 %v1600_v60, %v1599_v18 }
0x14da   :  { %2016 = vmatprep.mubr.msk.f32.mxu1 %vm73_vm0, %v2875_v62  ;;  %v1602_v62 = vld [vmem:[%s3098_s8 + $0x18] sm:$0xff] }
0x14db   :  { %2239 = vmatprep.subr.bf16.mxu1 %v2238_v61 }
0x14dc   :  { %2241 = vmatpush3.bf16.msra.mxu1 %v2238_v61 }
0x14dd   :  { %2017 = vmatmul.mubr.msk.f32.gmra.mrb[30].mxu1 %vm73_vm0, %v2879_v63  ;;  %v2242_v63 = vpack.c.bf16 %v1602_v62, %v1601_v20 }
0x14de   :  { %2019 = vmatprep.mubr.msk.f32.mxu1 %vm73_vm0, %v2883_v0  ;;  %v1603_v0 = vld [vmem:[%s3098_s8 + $0x20] sm:$0xff] }
0x14df   :  { %2243 = vmatprep.subr.bf16.mxu1 %v2242_v63 }
0x14e0   :  { %2245 = vmatpush3.bf16.msra.mxu1 %v2242_v63 }
0x14e1   :  { %2020 = vmatmul.mubr.msk.f32.gmra.mrb[32].mxu1 %vm73_vm0, %v2887_v2  ;;  %v1604_v2 = vld [vmem:[%s3098_s8 + $0x28] sm:$0xff] }
0x14e2   :  { %v2246_v31 = vpack.c.bf16 %v1604_v2, %v1603_v0 }
0x14e4   :  { %2247 = vmatprep.subr.bf16.mxu1 %v2246_v31 }
0x14e5   :  { %2249 = vmatpush3.bf16.msra.mxu1 %v2246_v31 }
0x14e6   :  { %2251 = vmatprep.subr.bf16.mxu1 %v2250_v36 }
0x14e9   :  { %2253 = vmatpush3.bf16.msra.mxu1 %v2250_v36 }
0x1598   :  { %v1482_v37 = vpop.f32.mrb[24].mxu1 }
0x1599   :  { %v1993_v40 = vpop.f32.mrb[25].mxu1  ;;  %v1483_v30 = vadd.f32 %v1871_v27, %v1482_v37 }
0x15a8   :  { %v2012_v14 = vpop.f32.mrb[26].mxu1 }
0x15a9   :  { %v1592_v41 = vadd.f32 %v2012_v14, %v1483_v30  ;;  %v1552_v3 = vpop.f32.mrb[27].mxu1 }
0x15aa   :  { %v1591_v16 = vadd.f32 %v1552_v3, %v1483_v30 }
0x15ac   :  { %v2015_v42 = vpop.f32.mrb[28].mxu1  ;;  %2038 = vmatprep.mubr.msk.f32.mxu1 %vm73_vm0, %v1591_v16 }
0x15ad   :  { %v1594_v43 = vadd.f32 %v2015_v42, %v1483_v30  ;;  %v1562_v44 = vpop.f32.mrb[29].mxu1  ;;  %2039 = vmatmul.mubr.msk.f32.vlgmr.msra.gmra.mrb[34].mxu1 %vm73_vm0, %v1592_v41 }
0x15ae   :  { %v1593_v47 = vadd.f32 %v1562_v44, %v1483_v30 }
0x15b0   :  { %v2018_v6 = vpop.f32.mrb[30].mxu1  ;;  %2041 = vmatprep.mubr.msk.f32.mxu1 %vm73_vm0, %v1593_v47 }
0x15b1   :  { %v1596_v48 = vadd.f32 %v2018_v6, %v1483_v30  ;;  %v1572_v8 = vpop.f32.mrb[31].mxu1  ;;  %2042 = vmatmul.mubr.msk.f32.gmra.mrb[36].mxu1 %vm73_vm0, %v1594_v43 }
0x15b2   :  { %v1595_v49 = vadd.f32 %v1572_v8, %v1483_v30 }
0x15b4   :  { %v2021_v51 = vpop.f32.mrb[32].mxu1  ;;  %2044 = vmatprep.mubr.msk.f32.mxu1 %vm73_vm0, %v1595_v49 }
0x15b5   :  { %v1598_v52 = vadd.f32 %v2021_v51, %v1483_v30  ;;  %v1582_v53 = vpop.f32.mrb[33].mxu1  ;;  %2045 = vmatmul.mubr.msk.f32.gmra.mrb[38].mxu1 %vm73_vm0, %v1596_v48 }
0x15b6   :  { %v1597_v54 = vadd.f32 %v1582_v53, %v1483_v30 }
0x15b8   :  { %2047 = vmatprep.mubr.msk.f32.mxu1 %vm73_vm0, %v1597_v54 }
0x15b9   :  { %2048 = vmatmul.mubr.msk.f32.gmra.mrb[40].mxu1 %vm73_vm0, %v1598_v52 }
0x1680   :  { %v2040_v56 = vpop.f32.mrb[34].mxu1 }
0x1681   :  { %v1710_v57 = vadd.f32 %v2040_v56, %v1881_v55  ;;  %v1704_v58 = vpop.f32.mrb[35].mxu1 }
0x1682   :  { %v1705_v24 = vadd.f32 %v1881_v55, %v1704_v58 }
0x1683   :  { %1745 = vmax.xlane.f32.xlu0 %v1710_v57 }
0x1684   :  { %v2043_v59 = vpop.f32.mrb[36].mxu1  ;;  %1743 = vmax.xlane.f32.xlu1 %v1705_v24 }
0x1685   :  { %v1720_v10 = vadd.f32 %v2043_v59, %v1881_v55  ;;  %v1714_v28 = vpop.f32.mrb[37].mxu1 }
0x1686   :  { %v1715_v38 = vadd.f32 %v1881_v55, %v1714_v28 }
0x1687   :  { %1749 = vmax.xlane.f32.xlu0 %v1720_v10 }
0x1688   :  { %v2046_v39 = vpop.f32.mrb[38].mxu1  ;;  %1747 = vmax.xlane.f32.xlu1 %v1715_v38 }
0x1689   :  { %v1730_v5 = vadd.f32 %v2046_v39, %v1881_v55  ;;  %v1724_v12 = vpop.f32.mrb[39].mxu1 }
0x168a   :  { %v1725_v7 = vadd.f32 %v1881_v55, %v1724_v12 }
0x168b   :  { %1753 = vmax.xlane.f32.xlu0 %v1730_v5 }
0x168c   :  { %1751 = vmax.xlane.f32.xlu1 %v1725_v7  ;;  %v2049_v46 = vpop.f32.mrb[40].mxu1 }
0x168d   :  { %v1740_v50 = vadd.f32 %v2049_v46, %v1881_v55  ;;  %v1734_v11 = vpop.f32.mrb[41].mxu1 }
0x168e   :  { %v1735_v22 = vadd.f32 %v1881_v55, %v1734_v11 }
0x168f   :  { %1757 = vmax.xlane.f32.xlu0 %v1740_v50 }
0x1690   :  { %1755 = vmax.xlane.f32.xlu1 %v1735_v22 }
0x1710   :  { %v1746_v13 = vpop.xlane.xlu0 %1745 }
0x1711   :  { %v1760_v9 = vsub.f32 %v1710_v57, %v1746_v13  ;;  %v1744_v25 = vpop.xlane.xlu1 %1743 }
0x1712   :  { %v1759_v32 = vsub.f32 %v1705_v24, %v1744_v25 }
0x1713   :  { %v1769_v1 = vmul.f32 1.442695, %v1760_v9 }
0x1714   :  { %v1767_v15 = vmul.f32 1.442695, %v1759_v32  ;;  %v1750_v4 = vpop.xlane.xlu0 %1749 }
0x1715   :  { %2418 = vpow2.f32 %v1769_v1  ;;  %v1762_v17 = vsub.f32 %v1720_v10, %v1750_v4  ;;  %v1748_v19 = vpop.xlane.xlu1 %1747 }
0x1716   :  { %2420 = vpow2.f32 %v1767_v15  ;;  %v1761_v45 = vsub.f32 %v1715_v38, %v1748_v19 }
0x1717   :  { %v1773_v21 = vmul.f32 1.442695, %v1762_v17 }
0x1718   :  { %v1771_v23 = vmul.f32 1.442695, %v1761_v45  ;;  %v1754_v26 = vpop.xlane.xlu0 %1753 }
0x1719   :  { %2422 = vpow2.f32 %v1773_v21  ;;  %v1764_v29 = vsub.f32 %v1730_v5, %v1754_v26  ;;  %v1752_v33 = vpop.xlane.xlu1 %1751 }
0x171a   :  { %2424 = vpow2.f32 %v1771_v23  ;;  %v1763_v18 = vsub.f32 %v1725_v7, %v1752_v33 }
0x171b   :  { %v1777_v60 = vmul.f32 1.442695, %v1764_v29 }
0x171c   :  { %v1775_v20 = vmul.f32 1.442695, %v1763_v18  ;;  %v1758_v61 = vpop.xlane.xlu0 %1757 }
0x171d   :  { %2426 = vpow2.f32 %v1777_v60  ;;  %v1766_v62 = vsub.f32 %v1740_v50, %v1758_v61  ;;  %v1756_v63 = vpop.xlane.xlu1 %1755 }
0x171e   :  { %2428 = vpow2.f32 %v1775_v20  ;;  %v1765_v0 = vsub.f32 %v1735_v22, %v1756_v63 }
0x171f   :  { %v2419_v2 = vpop.eup %2418  ;;  %v1781_v31 = vmul.f32 1.442695, %v1766_v62 }
0x1720   :  { %v2421_v34 = vpop.eup %2420  ;;  %v1779_v35 = vmul.f32 1.442695, %v1765_v0  ;;  %1785 = vadd.xlane.f32.xlu0 %v2419_v2 }
0x1721   :  { %2430 = vpow2.f32 %v1781_v31  ;;  %1783 = vadd.xlane.f32.xlu1 %v2421_v34 }
0x1722   :  { %2432 = vpow2.f32 %v1779_v35 }
0x1723   :  { %v2423_v36 = vpop.eup %2422 }
0x1724   :  { %v2425_v37 = vpop.eup %2424  ;;  %1789 = vadd.xlane.f32.xlu0 %v2423_v36 }
0x1725   :  { %1787 = vadd.xlane.f32.xlu1 %v2425_v37 }
0x1727   :  { %v2427_v40 = vpop.eup %2426 }
0x1728   :  { %v2429_v27 = vpop.eup %2428  ;;  %1793 = vadd.xlane.f32.xlu0 %v2427_v40 }
0x1729   :  { %1791 = vadd.xlane.f32.xlu1 %v2429_v27 }
0x172b   :  { %v2431_v30 = vpop.eup %2430 }
0x172c   :  { %v2433_v14 = vpop.eup %2432  ;;  %1797 = vadd.xlane.f32.xlu0 %v2431_v30 }
0x172d   :  { %1795 = vadd.xlane.f32.xlu1 %v2433_v14 }
0x17ad   :  { %v1786_v41 = vpop.xlane.xlu0 %1785 }
0x17ae   :  { %2434 = vrcp.f32 %v1786_v41  ;;  %v1784_v3 = vpop.xlane.xlu1 %1783 }
0x17af   :  { %2436 = vrcp.f32 %v1784_v3 }
0x17b1   :  { %v1790_v16 = vpop.xlane.xlu0 %1789 }
0x17b2   :  { %2438 = vrcp.f32 %v1790_v16  ;;  %v1788_v42 = vpop.xlane.xlu1 %1787 }
0x17b3   :  { %2440 = vrcp.f32 %v1788_v42 }
0x17b5   :  { %v1794_v43 = vpop.xlane.xlu0 %1793 }
0x17b6   :  { %2442 = vrcp.f32 %v1794_v43  ;;  %v1792_v44 = vpop.xlane.xlu1 %1791 }
0x17b7   :  { %2444 = vrcp.f32 %v1792_v44 }
0x17b8   :  { %v2435_v47 = vpop.eup %2434 }
0x17b9   :  { %v2437_v6 = vpop.eup %2436  ;;  %v1808_v48 = vmul.f32 %v2435_v47, %v2419_v2  ;;  %v1798_v8 = vpop.xlane.xlu0 %1797 }
0x17ba   :  { %v1807_v49 = vmul.f32 %v2437_v6, %v2421_v34  ;;  %2446 = vrcp.f32 %v1798_v8  ;;  %v1796_v51 = vpop.xlane.xlu1 %1795 }
0x17bb   :  { %1816 = vst [vmem:[%s3101_s10 + $0x8] sm:$0xff] %v1808_v48  ;;  %2448 = vrcp.f32 %v1796_v51 }
0x17bc   :  { %v2439_v52 = vpop.eup %2438  ;;  %1815 = vst [vmem:[%s3101_s10] sm:$0xff] %v1807_v49 }
0x17bd   :  { %v2441_v53 = vpop.eup %2440  ;;  %v1810_v54 = vmul.f32 %v2439_v52, %v2423_v36 }
0x17be   :  { %v1809_v55 = vmul.f32 %v2441_v53, %v2425_v37 }
0x17bf   :  { %1818 = vst [vmem:[%s3101_s10 + $0x18] sm:$0xff] %v1810_v54 }
0x17c0   :  { %v2443_v56 = vpop.eup %2442  ;;  %1817 = vst [vmem:[%s3101_s10 + $0x10] sm:$0xff] %v1809_v55 }
0x17c1   :  { %v2445_v57 = vpop.eup %2444  ;;  %v1812_v58 = vmul.f32 %v2443_v56, %v2427_v40 }
0x17c2   :  { %v1811_v24 = vmul.f32 %v2445_v57, %v2429_v27 }
0x17c3   :  { %1820 = vst [vmem:[%s3101_s10 + $0x28] sm:$0xff] %v1812_v58 }
0x17c4   :  { %v2447_v59 = vpop.eup %2446  ;;  %1819 = vst [vmem:[%s3101_s10 + $0x20] sm:$0xff] %v1811_v24 }
0x17c5   :  { %v2449_v10 = vpop.eup %2448  ;;  %v1814_v28 = vmul.f32 %v2447_v59, %v2431_v30 }
0x17c6   :  { %v1813_v38 = vmul.f32 %v2449_v10, %v2433_v14 }
0x17c7   :  { %1822 = vst [vmem:[%s3101_s10 + $0x38] sm:$0xff] %v1814_v28 }
0x17c8   :  { %1821 = vst [vmem:[%s3101_s10 + $0x30] sm:$0xff] %v1813_v38 }

</bundles_post_ra>
